<compile_context>
chip_gen: v7x
topology: tpu7x:2x2x1
jax: 0.10.0
libtpu: 0.0.40
codegen_flags: <defaults>
</compile_context>

<pallas_src>
import jax
import jax.numpy as jnp
from jax import lax
from jax.experimental import pallas as pl
from jax.experimental.pallas import tpu as pltpu


def _fclstm_kernel(seq_ref, pre_ref,
                   wih_ref, whh_ref,
                   w1p_ref, whs_ref, w2_ref,
                   bias_ref,
                   out_ref):
    T, Fin, Bt = seq_ref.shape
    H4, H = whh_ref.shape                    # (4H, H)
    fc = whs_ref.shape[0]

    wih = wih_ref[...]                       # (4H, Fin)
    whh = whh_ref[...]                       # (4H, H)
    b_lstm = bias_ref[:H4, 0:1]              # (4H, 1) combined b_ih + b_hh
    b_head = bias_ref[:fc, 1:2]              # (fc, 1) folded BN + head bias
    b_out = bias_ref[0:1, 2:3]               # (1, 1)

    # Hoisted input projection: T independent small matmuls, off the serial
    # critical path (scheduler overlaps them with the recurrence prologue).
    gx = [jnp.dot(wih, seq_ref[t], preferred_element_type=jnp.float32) + b_lstm
          for t in range(T)]                 # each (4H, Bt)

    # Sublane row mask for the g-gate block (PyTorch gate order i, f, g, o).
    row = lax.broadcasted_iota(jnp.int32, (H4, Bt), 0)
    g_off = jnp.where((row >= 2 * H) & (row < 3 * H), 1.0, 0.0)
    g_scale = 1.0 + g_off                    # 2 on g-gate rows, 1 elsewhere

    h = jnp.zeros((H, Bt), jnp.float32)
    c = jnp.zeros((H, Bt), jnp.float32)

    # Fully unrolled recurrence (T is small & static).  One sigmoid pass per
    # step: tanh(x) = 2*sigmoid(2x) - 1 on the g-gate rows.
    for t in range(T):
        gates = gx[t] + jnp.dot(whh, h, preferred_element_type=jnp.float32)
        s = jax.nn.sigmoid(g_scale * gates)          # single EUP pass (4H, Bt)
        act = g_scale * s - g_off                    # tanh on g rows, sigmoid else
        i_g = act[0 * H:1 * H, :]
        f_g = act[1 * H:2 * H, :]
        g_g = act[2 * H:3 * H, :]
        o_g = act[3 * H:4 * H, :]
        c = f_g * c + i_g * g_g
        h = o_g * jnp.tanh(c)

    # Fused, transposed head: LSTM_FEAT Linear, fc[0] Linear and eval-mode
    # BatchNorm were folded into (w1p, w_hs, b_head) in the wrapper.
    z = (jnp.dot(w1p_ref[...], pre_ref[...], preferred_element_type=jnp.float32)
         + jnp.dot(whs_ref[...], h, preferred_element_type=jnp.float32)
         + b_head)                                   # (fc, Bt)
    z = jnp.where(z >= 0, z, 0.01 * z)               # LeakyReLU (slope 0.01)
    y = jnp.dot(w2_ref[...], z, preferred_element_type=jnp.float32) + b_out
    out_ref[...] = jax.nn.sigmoid(y)                 # lane-dense (1, Bt) store


def init_params(key, feature_num, seq_feature_num=16, fc_hidden=32, lstm_hidden=32):
    ks = jax.random.split(key, 9)

    def w(k, shape, scale=0.1):
        return (scale * jax.random.normal(k, shape)).astype(jnp.float32)

    H = lstm_hidden
    return dict(
        wih=w(ks[0], (feature_num, 4 * H)),
        whh=w(ks[1], (H, 4 * H)),
        b=w(ks[2], (1, 4 * H)),                          # b_ih + b_hh combined
        wp=w(ks[3], (H, seq_feature_num)),
        bp=w(ks[4], (1, seq_feature_num)),
        w1=w(ks[5], (feature_num - 1 + seq_feature_num, fc_hidden)),
        b1=w(ks[6], (1, fc_hidden)),
        gamma=jnp.ones((1, fc_hidden), jnp.float32),
        beta=jnp.zeros((1, fc_hidden), jnp.float32),
        running_mean=jnp.zeros((1, fc_hidden), jnp.float32),
        running_var=jnp.ones((1, fc_hidden), jnp.float32),
        w2=w(ks[7], (fc_hidden, 1)),
        b2=w(ks[8], (1, 1)),
    )


def _fold_params(params, feature_num):
    """Fold BatchNorm (eval) and the LSTM_FEAT head Linear into fc[0]."""
    eps = 1e-5
    scale = params["gamma"] / jnp.sqrt(params["running_var"] + eps)   # (1, fc)
    shift = params["beta"] - params["running_mean"] * scale           # (1, fc)
    w1p_f = params["w1"][:feature_num - 1] * scale                    # (F-1, fc)
    w1s_f = params["w1"][feature_num - 1:] * scale                    # (S,  fc)
    w_hs = params["wp"] @ w1s_f                                       # (H,  fc)
    b_head = params["b1"] * scale + shift + params["bp"] @ w1s_f      # (1,  fc)
    return w1p_f, w_hs, b_head


def _pick_bt(B):
    if B <= 128:
        return B          # single tile
    if B < 512:
        return 128        # >= 2 grid steps -> both v7x TensorCores busy
    return 256            # fill the 256-row MXU on v6e / v7x


def fclstm_forward(x, params, feature_num):
    B, seq_len, _ = x.shape
    T = seq_len - 1
    H = params["whh"].shape[0]
    fc = params["w1"].shape[1]
    H4 = 4 * H

    # pre_day_info = x[:, -1, :-2]; seq_day_info = cat(x[:, :-1, :-2], x[:, :-1, -1:])
    pre = x[:, -1, :-2].astype(jnp.float32)                              # (B, F-1)
    seq = jnp.concatenate([x[:, :-1, :-2], x[:, :-1, -1:]], axis=2)      # (B, T, Fin)

    w1p_f, w_hs, b_head = _fold_params(params, feature_num)

    # Transposed operands: batch sits in lanes inside the kernel.
    pre_t = pre.T                                                        # (F-1, B)
    seq_t = jnp.transpose(seq, (1, 2, 0)).astype(jnp.float32)            # (T, Fin, B)
    wih_t = params["wih"].T                                              # (4H, Fin)
    whh_t = params["whh"].T                                              # (4H, H)
    w1p_t = w1p_f.T                                                      # (fc, F-1)
    whs_t = w_hs.T                                                       # (fc, H)
    w2_t = params["w2"].T                                                # (1, fc)

    # Pack the tiny bias columns into a single operand: (max(4H, fc), 3).
    W = max(H4, fc, 1)
    bias_pack = jnp.zeros((W, 3), jnp.float32)
    bias_pack = bias_pack.at[:H4, 0].set(params["b"][0])
    bias_pack = bias_pack.at[:fc, 1].set(b_head[0])
    bias_pack = bias_pack.at[:1, 2].set(params["b2"][0])

    Bt = _pick_bt(B)
    nb = pl.cdiv(B, Bt)
    Bp = nb * Bt
    if Bp != B:
        pre_t = jnp.pad(pre_t, ((0, 0), (0, Bp - B)))
        seq_t = jnp.pad(seq_t, ((0, 0), (0, 0), (0, Bp - B)))

    Fin = seq_t.shape[1]
    Fm1 = pre_t.shape[0]

    def full_spec(shape):
        return pl.BlockSpec(shape, lambda i, _n=len(shape): (0,) * _n)

    grid_spec = pltpu.PrefetchScalarGridSpec(
        num_scalar_prefetch=0,
        grid=(nb,),
        in_specs=[
            pl.BlockSpec((T, Fin, Bt), lambda i: (0, 0, i)),
            pl.BlockSpec((Fm1, Bt), lambda i: (0, i)),
            full_spec(wih_t.shape),
            full_spec(whh_t.shape),
            full_spec(w1p_t.shape),
            full_spec(whs_t.shape),
            full_spec(w2_t.shape),
            full_spec(bias_pack.shape),
        ],
        out_specs=pl.BlockSpec((1, Bt), lambda i: (i, 0)),
    )

    # Advisory cost hint so XLA schedules neighbors around the call.
    macs = Bp * (T * (Fin + H) * H4 + Fm1 * fc + H * fc + fc)
    cost = pl.CostEstimate(
        flops=2 * macs,
        transcendentals=Bp * (T * (H4 + H) + 1),
        bytes_accessed=4 * (seq_t.size + pre_t.size + wih_t.size + whh_t.size
                            + w1p_t.size + whs_t.size + w2_t.size
                            + bias_pack.size + Bp),
    )

    out = pl.pallas_call(
        _fclstm_kernel,
        out_shape=jax.ShapeDtypeStruct((nb, Bt), jnp.float32),
        grid_spec=grid_spec,
        compiler_params=pltpu.CompilerParams(
            dimension_semantics=("parallel",)),
        cost_estimate=cost,
    )(seq_t, pre_t, wih_t, whh_t, w1p_t, whs_t, w2_t, bias_pack)
    return out.reshape(Bp, 1)[:B]


def fclstm_reference(x, params, feature_num):
    """Pure-JAX reference with the original (unfolded) semantics."""
    pre = x[:, -1, :-2]
    seq = jnp.concatenate([x[:, :-1, :-2], x[:, :-1, -1:]], axis=2)
    seq_tm = jnp.transpose(seq, (1, 0, 2))
    B = x.shape[0]
    H = params["whh"].shape[0]

    def step(carry, x_t):
        h, c = carry
        gates = x_t @ params["wih"] + h @ params["whh"] + params["b"]
        i = jax.nn.sigmoid(gates[:, 0 * H:1 * H])
        f = jax.nn.sigmoid(gates[:, 1 * H:2 * H])
        g = jnp.tanh(gates[:, 2 * H:3 * H])
        o = jax.nn.sigmoid(gates[:, 3 * H:4 * H])
        c = f * c + i * g
        h = o * jnp.tanh(c)
        return (h, c), None

    (h_last, _), _ = lax.scan(step, (jnp.zeros((B, H)), jnp.zeros((B, H))), seq_tm)
    seq_feat = h_last @ params["wp"] + params["bp"]
    feat = jnp.concatenate([pre, seq_feat], axis=1)
    z = feat @ params["w1"] + params["b1"]
    eps = 1e-5
    scale = params["gamma"] / jnp.sqrt(params["running_var"] + eps)
    shift = params["beta"] - params["running_mean"] * scale
    z = z * scale + shift
    z = jnp.where(z >= 0, z, 0.01 * z)
    return jax.nn.sigmoid(z @ params["w2"] + params["b2"])


if __name__ == "__main__":
    feature_num = 6
    seq_len = 8
    batch = 4
    raw_feat = feature_num + 1    # forward slicing implies feature_num + 1 columns

    key = jax.random.PRNGKey(0)
    kx, kp = jax.random.split(key)
    x = jax.random.normal(kx, (batch, seq_len, raw_feat), dtype=jnp.float32)
    params = init_params(kp, feature_num, seq_feature_num=16, fc_hidden=32,
                         lstm_hidden=32)

    out = fclstm_forward(x, params, feature_num)
    out = jax.block_until_ready(out)

    ref = fclstm_reference(x, params, feature_num)
    assert out.shape == (batch, 1)
    assert jnp.allclose(out, ref, atol=1e-4, rtol=1e-4), (out, ref)
    print("KERNEL_OK")
</pallas_src>

<mosaic_0001>
module attributes {stable_mosaic.version = 11 : i64} {
  func.func @_fclstm_kernel(%arg0: i32, %arg1: memref<7x6x4xf32, #tpu.memory_space<vmem>>, %arg2: memref<5x4xf32, #tpu.memory_space<vmem>>, %arg3: memref<128x6xf32, #tpu.memory_space<vmem>>, %arg4: memref<128x32xf32, #tpu.memory_space<vmem>>, %arg5: memref<32x5xf32, #tpu.memory_space<vmem>>, %arg6: memref<32x32xf32, #tpu.memory_space<vmem>>, %arg7: memref<1x32xf32, #tpu.memory_space<vmem>>, %arg8: memref<128x3xf32, #tpu.memory_space<vmem>>, %arg9: memref<1x4xf32, #tpu.memory_space<vmem>>) attributes {dimension_semantics = [#tpu.dimension_semantics<parallel>], iteration_bounds = array<i64: 1>, scalar_prefetch = 0 : i64, scratch_operands = 0 : i64, tpu.core_type = #tpu.core_type<tc>, window_params = [{transform_indices = @transform_0, window_bounds = array<i64: 7, 6, 4>}, {transform_indices = @transform_1, window_bounds = array<i64: 5, 4>}, {pipeline_mode = #tpu.pipeline_mode<synchronous>, transform_indices = @transform_2, window_bounds = array<i64: 128, 6>}, {pipeline_mode = #tpu.pipeline_mode<synchronous>, transform_indices = @transform_3, window_bounds = array<i64: 128, 32>}, {pipeline_mode = #tpu.pipeline_mode<synchronous>, transform_indices = @transform_4, window_bounds = array<i64: 32, 5>}, {pipeline_mode = #tpu.pipeline_mode<synchronous>, transform_indices = @transform_5, window_bounds = array<i64: 32, 32>}, {pipeline_mode = #tpu.pipeline_mode<synchronous>, transform_indices = @transform_6, window_bounds = array<i64: 1, 32>}, {pipeline_mode = #tpu.pipeline_mode<synchronous>, transform_indices = @transform_7, window_bounds = array<i64: 128, 3>}, {transform_indices = @transform_8, window_bounds = array<i64: 1, 4>}]} {
    %c0 = arith.constant 0 : index
    %c0_0 = arith.constant 0 : index
    %0 = vector.load %arg3[%c0, %c0_0] : memref<128x6xf32, #tpu.memory_space<vmem>>, vector<128x6xf32>
    %c0_1 = arith.constant 0 : index
    %c0_2 = arith.constant 0 : index
    %1 = vector.load %arg4[%c0_1, %c0_2] : memref<128x32xf32, #tpu.memory_space<vmem>>, vector<128x32xf32>
    %c0_3 = arith.constant 0 : index
    %c0_4 = arith.constant 0 : index
    %2 = vector.load %arg8[%c0_3, %c0_4] : memref<128x3xf32, #tpu.memory_space<vmem>>, vector<128x1xf32>
    %c0_5 = arith.constant 0 : index
    %c1 = arith.constant 1 : index
    %3 = vector.load %arg8[%c0_5, %c1] : memref<128x3xf32, #tpu.memory_space<vmem>>, vector<32x1xf32>
    %c0_6 = arith.constant 0 : index
    %c2 = arith.constant 2 : index
    %4 = vector.load %arg8[%c0_6, %c2] : memref<128x3xf32, #tpu.memory_space<vmem>>, vector<1x1xf32>
    %c0_7 = arith.constant 0 : index
    %c0_8 = arith.constant 0 : index
    %c0_9 = arith.constant 0 : index
    %5 = vector.load %arg1[%c0_7, %c0_8, %c0_9] : memref<7x6x4xf32, #tpu.memory_space<vmem>>, vector<1x6x4xf32>
    %6 = vector.shape_cast %5 : vector<1x6x4xf32> to vector<6x4xf32>
    %cst = arith.constant dense<0.000000e+00> : vector<128x4xf32>
    %7 = tpu.matmul %0, %6, %cst {dimension_numbers = #tpu.dot_dimension_numbers<[1], [0], [0], [1], [0, 0, 1, 1], [], []>} : vector<128x6xf32>, vector<6x4xf32>, vector<128x4xf32> -> vector<128x4xf32>
    %8 = vector.broadcast %2 : vector<128x1xf32> to vector<128x4xf32>
    %9 = arith.addf %7, %8 : vector<128x4xf32>
    %c1_10 = arith.constant 1 : index
    %c0_11 = arith.constant 0 : index
    %c0_12 = arith.constant 0 : index
    %10 = vector.load %arg1[%c1_10, %c0_11, %c0_12] : memref<7x6x4xf32, #tpu.memory_space<vmem>>, vector<1x6x4xf32>
    %11 = vector.shape_cast %10 : vector<1x6x4xf32> to vector<6x4xf32>
    %cst_13 = arith.constant dense<0.000000e+00> : vector<128x4xf32>
    %12 = tpu.matmul %0, %11, %cst_13 {dimension_numbers = #tpu.dot_dimension_numbers<[1], [0], [0], [1], [0, 0, 1, 1], [], []>} : vector<128x6xf32>, vector<6x4xf32>, vector<128x4xf32> -> vector<128x4xf32>
    %13 = vector.broadcast %2 : vector<128x1xf32> to vector<128x4xf32>
    %14 = arith.addf %12, %13 : vector<128x4xf32>
    %c2_14 = arith.constant 2 : index
    %c0_15 = arith.constant 0 : index
    %c0_16 = arith.constant 0 : index
    %15 = vector.load %arg1[%c2_14, %c0_15, %c0_16] : memref<7x6x4xf32, #tpu.memory_space<vmem>>, vector<1x6x4xf32>
    %16 = vector.shape_cast %15 : vector<1x6x4xf32> to vector<6x4xf32>
    %cst_17 = arith.constant dense<0.000000e+00> : vector<128x4xf32>
    %17 = tpu.matmul %0, %16, %cst_17 {dimension_numbers = #tpu.dot_dimension_numbers<[1], [0], [0], [1], [0, 0, 1, 1], [], []>} : vector<128x6xf32>, vector<6x4xf32>, vector<128x4xf32> -> vector<128x4xf32>
    %18 = vector.broadcast %2 : vector<128x1xf32> to vector<128x4xf32>
    %19 = arith.addf %17, %18 : vector<128x4xf32>
    %c3 = arith.constant 3 : index
    %c0_18 = arith.constant 0 : index
    %c0_19 = arith.constant 0 : index
    %20 = vector.load %arg1[%c3, %c0_18, %c0_19] : memref<7x6x4xf32, #tpu.memory_space<vmem>>, vector<1x6x4xf32>
    %21 = vector.shape_cast %20 : vector<1x6x4xf32> to vector<6x4xf32>
    %cst_20 = arith.constant dense<0.000000e+00> : vector<128x4xf32>
    %22 = tpu.matmul %0, %21, %cst_20 {dimension_numbers = #tpu.dot_dimension_numbers<[1], [0], [0], [1], [0, 0, 1, 1], [], []>} : vector<128x6xf32>, vector<6x4xf32>, vector<128x4xf32> -> vector<128x4xf32>
    %23 = vector.broadcast %2 : vector<128x1xf32> to vector<128x4xf32>
    %24 = arith.addf %22, %23 : vector<128x4xf32>
    %c4 = arith.constant 4 : index
    %c0_21 = arith.constant 0 : index
    %c0_22 = arith.constant 0 : index
    %25 = vector.load %arg1[%c4, %c0_21, %c0_22] : memref<7x6x4xf32, #tpu.memory_space<vmem>>, vector<1x6x4xf32>
    %26 = vector.shape_cast %25 : vector<1x6x4xf32> to vector<6x4xf32>
    %cst_23 = arith.constant dense<0.000000e+00> : vector<128x4xf32>
    %27 = tpu.matmul %0, %26, %cst_23 {dimension_numbers = #tpu.dot_dimension_numbers<[1], [0], [0], [1], [0, 0, 1, 1], [], []>} : vector<128x6xf32>, vector<6x4xf32>, vector<128x4xf32> -> vector<128x4xf32>
    %28 = vector.broadcast %2 : vector<128x1xf32> to vector<128x4xf32>
    %29 = arith.addf %27, %28 : vector<128x4xf32>
    %c5 = arith.constant 5 : index
    %c0_24 = arith.constant 0 : index
    %c0_25 = arith.constant 0 : index
    %30 = vector.load %arg1[%c5, %c0_24, %c0_25] : memref<7x6x4xf32, #tpu.memory_space<vmem>>, vector<1x6x4xf32>
    %31 = vector.shape_cast %30 : vector<1x6x4xf32> to vector<6x4xf32>
    %cst_26 = arith.constant dense<0.000000e+00> : vector<128x4xf32>
    %32 = tpu.matmul %0, %31, %cst_26 {dimension_numbers = #tpu.dot_dimension_numbers<[1], [0], [0], [1], [0, 0, 1, 1], [], []>} : vector<128x6xf32>, vector<6x4xf32>, vector<128x4xf32> -> vector<128x4xf32>
    %33 = vector.broadcast %2 : vector<128x1xf32> to vector<128x4xf32>
    %34 = arith.addf %32, %33 : vector<128x4xf32>
    %c6 = arith.constant 6 : index
    %c0_27 = arith.constant 0 : index
    %c0_28 = arith.constant 0 : index
    %35 = vector.load %arg1[%c6, %c0_27, %c0_28] : memref<7x6x4xf32, #tpu.memory_space<vmem>>, vector<1x6x4xf32>
    %36 = vector.shape_cast %35 : vector<1x6x4xf32> to vector<6x4xf32>
    %cst_29 = arith.constant dense<0.000000e+00> : vector<128x4xf32>
    %37 = tpu.matmul %0, %36, %cst_29 {dimension_numbers = #tpu.dot_dimension_numbers<[1], [0], [0], [1], [0, 0, 1, 1], [], []>} : vector<128x6xf32>, vector<6x4xf32>, vector<128x4xf32> -> vector<128x4xf32>
    %38 = vector.broadcast %2 : vector<128x1xf32> to vector<128x4xf32>
    %39 = arith.addf %37, %38 : vector<128x4xf32>
    %40 = tpu.iota {dimensions = array<i32: 0>} : vector<128x4xi32>
    %c64_i32 = arith.constant 64 : i32
    %41 = vector.broadcast %c64_i32 : i32 to vector<128x4xi32>
    %42 = arith.cmpi sge, %40, %41 : vector<128x4xi32>
    %c96_i32 = arith.constant 96 : i32
    %43 = vector.broadcast %c96_i32 : i32 to vector<128x4xi32>
    %44 = arith.cmpi slt, %40, %43 : vector<128x4xi32>
    %45 = arith.andi %42, %44 : vector<128x4xi1>
    %cst_30 = arith.constant 1.000000e+00 : f32
    %cst_31 = arith.constant 0.000000e+00 : f32
    %46 = vector.broadcast %cst_30 : f32 to vector<128x4xf32>
    %47 = vector.broadcast %cst_31 : f32 to vector<128x4xf32>
    %48 = arith.select %45, %46, %47 : vector<128x4xi1>, vector<128x4xf32>
    %cst_32 = arith.constant 1.000000e+00 : f32
    %49 = vector.broadcast %cst_32 : f32 to vector<128x4xf32>
    %50 = arith.addf %49, %48 : vector<128x4xf32>
    %cst_33 = arith.constant 0.000000e+00 : f32
    %51 = vector.broadcast %cst_33 : f32 to vector<32x4xf32>
    %cst_34 = arith.constant 0.000000e+00 : f32
    %52 = vector.broadcast %cst_34 : f32 to vector<32x4xf32>
    %cst_35 = arith.constant dense<0.000000e+00> : vector<128x4xf32>
    %53 = tpu.matmul %1, %51, %cst_35 {dimension_numbers = #tpu.dot_dimension_numbers<[1], [0], [0], [1], [0, 0, 1, 1], [], []>} : vector<128x32xf32>, vector<32x4xf32>, vector<128x4xf32> -> vector<128x4xf32>
    %54 = arith.addf %9, %53 : vector<128x4xf32>
    %55 = arith.mulf %50, %54 : vector<128x4xf32>
    %56 = arith.negf %55 : vector<128x4xf32>
    %57 = math.exp %56 : vector<128x4xf32>
    %cst_36 = arith.constant 1.000000e+00 : f32
    %58 = vector.broadcast %cst_36 : f32 to vector<128x4xf32>
    %59 = arith.addf %58, %57 : vector<128x4xf32>
    %60 = arith.divf %58, %59 : vector<128x4xf32>
    %61 = arith.mulf %50, %60 : vector<128x4xf32>
    %62 = arith.subf %61, %48 : vector<128x4xf32>
    %63 = vector.extract_strided_slice %62 {offsets = [0, 0], sizes = [32, 4], strides = [1, 1]} : vector<128x4xf32> to vector<32x4xf32>
    %64 = vector.extract_strided_slice %62 {offsets = [32, 0], sizes = [32, 4], strides = [1, 1]} : vector<128x4xf32> to vector<32x4xf32>
    %65 = vector.extract_strided_slice %62 {offsets = [64, 0], sizes = [32, 4], strides = [1, 1]} : vector<128x4xf32> to vector<32x4xf32>
    %66 = vector.extract_strided_slice %62 {offsets = [96, 0], sizes = [32, 4], strides = [1, 1]} : vector<128x4xf32> to vector<32x4xf32>
    %67 = arith.mulf %64, %52 : vector<32x4xf32>
    %68 = arith.mulf %63, %65 : vector<32x4xf32>
    %69 = arith.addf %67, %68 : vector<32x4xf32>
    %70 = math.tanh %69 : vector<32x4xf32>
    %71 = arith.mulf %66, %70 : vector<32x4xf32>
    %cst_37 = arith.constant dense<0.000000e+00> : vector<128x4xf32>
    %72 = tpu.matmul %1, %71, %cst_37 {dimension_numbers = #tpu.dot_dimension_numbers<[1], [0], [0], [1], [0, 0, 1, 1], [], []>} : vector<128x32xf32>, vector<32x4xf32>, vector<128x4xf32> -> vector<128x4xf32>
    %73 = arith.addf %14, %72 : vector<128x4xf32>
    %74 = arith.mulf %50, %73 : vector<128x4xf32>
    %75 = arith.negf %74 : vector<128x4xf32>
    %76 = math.exp %75 : vector<128x4xf32>
    %cst_38 = arith.constant 1.000000e+00 : f32
    %77 = vector.broadcast %cst_38 : f32 to vector<128x4xf32>
    %78 = arith.addf %77, %76 : vector<128x4xf32>
    %79 = arith.divf %77, %78 : vector<128x4xf32>
    %80 = arith.mulf %50, %79 : vector<128x4xf32>
    %81 = arith.subf %80, %48 : vector<128x4xf32>
    %82 = vector.extract_strided_slice %81 {offsets = [0, 0], sizes = [32, 4], strides = [1, 1]} : vector<128x4xf32> to vector<32x4xf32>
    %83 = vector.extract_strided_slice %81 {offsets = [32, 0], sizes = [32, 4], strides = [1, 1]} : vector<128x4xf32> to vector<32x4xf32>
    %84 = vector.extract_strided_slice %81 {offsets = [64, 0], sizes = [32, 4], strides = [1, 1]} : vector<128x4xf32> to vector<32x4xf32>
    %85 = vector.extract_strided_slice %81 {offsets = [96, 0], sizes = [32, 4], strides = [1, 1]} : vector<128x4xf32> to vector<32x4xf32>
    %86 = arith.mulf %83, %69 : vector<32x4xf32>
    %87 = arith.mulf %82, %84 : vector<32x4xf32>
    %88 = arith.addf %86, %87 : vector<32x4xf32>
    %89 = math.tanh %88 : vector<32x4xf32>
    %90 = arith.mulf %85, %89 : vector<32x4xf32>
    %cst_39 = arith.constant dense<0.000000e+00> : vector<128x4xf32>
    %91 = tpu.matmul %1, %90, %cst_39 {dimension_numbers = #tpu.dot_dimension_numbers<[1], [0], [0], [1], [0, 0, 1, 1], [], []>} : vector<128x32xf32>, vector<32x4xf32>, vector<128x4xf32> -> vector<128x4xf32>
    %92 = arith.addf %19, %91 : vector<128x4xf32>
    %93 = arith.mulf %50, %92 : vector<128x4xf32>
    %94 = arith.negf %93 : vector<128x4xf32>
    %95 = math.exp %94 : vector<128x4xf32>
    %cst_40 = arith.constant 1.000000e+00 : f32
    %96 = vector.broadcast %cst_40 : f32 to vector<128x4xf32>
    %97 = arith.addf %96, %95 : vector<128x4xf32>
    %98 = arith.divf %96, %97 : vector<128x4xf32>
    %99 = arith.mulf %50, %98 : vector<128x4xf32>
    %100 = arith.subf %99, %48 : vector<128x4xf32>
    %101 = vector.extract_strided_slice %100 {offsets = [0, 0], sizes = [32, 4], strides = [1, 1]} : vector<128x4xf32> to vector<32x4xf32>
    %102 = vector.extract_strided_slice %100 {offsets = [32, 0], sizes = [32, 4], strides = [1, 1]} : vector<128x4xf32> to vector<32x4xf32>
    %103 = vector.extract_strided_slice %100 {offsets = [64, 0], sizes = [32, 4], strides = [1, 1]} : vector<128x4xf32> to vector<32x4xf32>
    %104 = vector.extract_strided_slice %100 {offsets = [96, 0], sizes = [32, 4], strides = [1, 1]} : vector<128x4xf32> to vector<32x4xf32>
    %105 = arith.mulf %102, %88 : vector<32x4xf32>
    %106 = arith.mulf %101, %103 : vector<32x4xf32>
    %107 = arith.addf %105, %106 : vector<32x4xf32>
    %108 = math.tanh %107 : vector<32x4xf32>
    %109 = arith.mulf %104, %108 : vector<32x4xf32>
    %cst_41 = arith.constant dense<0.000000e+00> : vector<128x4xf32>
    %110 = tpu.matmul %1, %109, %cst_41 {dimension_numbers = #tpu.dot_dimension_numbers<[1], [0], [0], [1], [0, 0, 1, 1], [], []>} : vector<128x32xf32>, vector<32x4xf32>, vector<128x4xf32> -> vector<128x4xf32>
    %111 = arith.addf %24, %110 : vector<128x4xf32>
    %112 = arith.mulf %50, %111 : vector<128x4xf32>
    %113 = arith.negf %112 : vector<128x4xf32>
    %114 = math.exp %113 : vector<128x4xf32>
    %cst_42 = arith.constant 1.000000e+00 : f32
    %115 = vector.broadcast %cst_42 : f32 to vector<128x4xf32>
    %116 = arith.addf %115, %114 : vector<128x4xf32>
    %117 = arith.divf %115, %116 : vector<128x4xf32>
    %118 = arith.mulf %50, %117 : vector<128x4xf32>
    %119 = arith.subf %118, %48 : vector<128x4xf32>
    %120 = vector.extract_strided_slice %119 {offsets = [0, 0], sizes = [32, 4], strides = [1, 1]} : vector<128x4xf32> to vector<32x4xf32>
    %121 = vector.extract_strided_slice %119 {offsets = [32, 0], sizes = [32, 4], strides = [1, 1]} : vector<128x4xf32> to vector<32x4xf32>
    %122 = vector.extract_strided_slice %119 {offsets = [64, 0], sizes = [32, 4], strides = [1, 1]} : vector<128x4xf32> to vector<32x4xf32>
    %123 = vector.extract_strided_slice %119 {offsets = [96, 0], sizes = [32, 4], strides = [1, 1]} : vector<128x4xf32> to vector<32x4xf32>
    %124 = arith.mulf %121, %107 : vector<32x4xf32>
    %125 = arith.mulf %120, %122 : vector<32x4xf32>
    %126 = arith.addf %124, %125 : vector<32x4xf32>
    %127 = math.tanh %126 : vector<32x4xf32>
    %128 = arith.mulf %123, %127 : vector<32x4xf32>
    %cst_43 = arith.constant dense<0.000000e+00> : vector<128x4xf32>
    %129 = tpu.matmul %1, %128, %cst_43 {dimension_numbers = #tpu.dot_dimension_numbers<[1], [0], [0], [1], [0, 0, 1, 1], [], []>} : vector<128x32xf32>, vector<32x4xf32>, vector<128x4xf32> -> vector<128x4xf32>
    %130 = arith.addf %29, %129 : vector<128x4xf32>
    %131 = arith.mulf %50, %130 : vector<128x4xf32>
    %132 = arith.negf %131 : vector<128x4xf32>
    %133 = math.exp %132 : vector<128x4xf32>
    %cst_44 = arith.constant 1.000000e+00 : f32
    %134 = vector.broadcast %cst_44 : f32 to vector<128x4xf32>
    %135 = arith.addf %134, %133 : vector<128x4xf32>
    %136 = arith.divf %134, %135 : vector<128x4xf32>
    %137 = arith.mulf %50, %136 : vector<128x4xf32>
    %138 = arith.subf %137, %48 : vector<128x4xf32>
    %139 = vector.extract_strided_slice %138 {offsets = [0, 0], sizes = [32, 4], strides = [1, 1]} : vector<128x4xf32> to vector<32x4xf32>
    %140 = vector.extract_strided_slice %138 {offsets = [32, 0], sizes = [32, 4], strides = [1, 1]} : vector<128x4xf32> to vector<32x4xf32>
    %141 = vector.extract_strided_slice %138 {offsets = [64, 0], sizes = [32, 4], strides = [1, 1]} : vector<128x4xf32> to vector<32x4xf32>
    %142 = vector.extract_strided_slice %138 {offsets = [96, 0], sizes = [32, 4], strides = [1, 1]} : vector<128x4xf32> to vector<32x4xf32>
    %143 = arith.mulf %140, %126 : vector<32x4xf32>
    %144 = arith.mulf %139, %141 : vector<32x4xf32>
    %145 = arith.addf %143, %144 : vector<32x4xf32>
    %146 = math.tanh %145 : vector<32x4xf32>
    %147 = arith.mulf %142, %146 : vector<32x4xf32>
    %cst_45 = arith.constant dense<0.000000e+00> : vector<128x4xf32>
    %148 = tpu.matmul %1, %147, %cst_45 {dimension_numbers = #tpu.dot_dimension_numbers<[1], [0], [0], [1], [0, 0, 1, 1], [], []>} : vector<128x32xf32>, vector<32x4xf32>, vector<128x4xf32> -> vector<128x4xf32>
    %149 = arith.addf %34, %148 : vector<128x4xf32>
    %150 = arith.mulf %50, %149 : vector<128x4xf32>
    %151 = arith.negf %150 : vector<128x4xf32>
    %152 = math.exp %151 : vector<128x4xf32>
    %cst_46 = arith.constant 1.000000e+00 : f32
    %153 = vector.broadcast %cst_46 : f32 to vector<128x4xf32>
    %154 = arith.addf %153, %152 : vector<128x4xf32>
    %155 = arith.divf %153, %154 : vector<128x4xf32>
    %156 = arith.mulf %50, %155 : vector<128x4xf32>
    %157 = arith.subf %156, %48 : vector<128x4xf32>
    %158 = vector.extract_strided_slice %157 {offsets = [0, 0], sizes = [32, 4], strides = [1, 1]} : vector<128x4xf32> to vector<32x4xf32>
    %159 = vector.extract_strided_slice %157 {offsets = [32, 0], sizes = [32, 4], strides = [1, 1]} : vector<128x4xf32> to vector<32x4xf32>
    %160 = vector.extract_strided_slice %157 {offsets = [64, 0], sizes = [32, 4], strides = [1, 1]} : vector<128x4xf32> to vector<32x4xf32>
    %161 = vector.extract_strided_slice %157 {offsets = [96, 0], sizes = [32, 4], strides = [1, 1]} : vector<128x4xf32> to vector<32x4xf32>
    %162 = arith.mulf %159, %145 : vector<32x4xf32>
    %163 = arith.mulf %158, %160 : vector<32x4xf32>
    %164 = arith.addf %162, %163 : vector<32x4xf32>
    %165 = math.tanh %164 : vector<32x4xf32>
    %166 = arith.mulf %161, %165 : vector<32x4xf32>
    %cst_47 = arith.constant dense<0.000000e+00> : vector<128x4xf32>
    %167 = tpu.matmul %1, %166, %cst_47 {dimension_numbers = #tpu.dot_dimension_numbers<[1], [0], [0], [1], [0, 0, 1, 1], [], []>} : vector<128x32xf32>, vector<32x4xf32>, vector<128x4xf32> -> vector<128x4xf32>
    %168 = arith.addf %39, %167 : vector<128x4xf32>
    %169 = arith.mulf %50, %168 : vector<128x4xf32>
    %170 = arith.negf %169 : vector<128x4xf32>
    %171 = math.exp %170 : vector<128x4xf32>
    %cst_48 = arith.constant 1.000000e+00 : f32
    %172 = vector.broadcast %cst_48 : f32 to vector<128x4xf32>
    %173 = arith.addf %172, %171 : vector<128x4xf32>
    %174 = arith.divf %172, %173 : vector<128x4xf32>
    %175 = arith.mulf %50, %174 : vector<128x4xf32>
    %176 = arith.subf %175, %48 : vector<128x4xf32>
    %177 = vector.extract_strided_slice %176 {offsets = [0, 0], sizes = [32, 4], strides = [1, 1]} : vector<128x4xf32> to vector<32x4xf32>
    %178 = vector.extract_strided_slice %176 {offsets = [32, 0], sizes = [32, 4], strides = [1, 1]} : vector<128x4xf32> to vector<32x4xf32>
    %179 = vector.extract_strided_slice %176 {offsets = [64, 0], sizes = [32, 4], strides = [1, 1]} : vector<128x4xf32> to vector<32x4xf32>
    %180 = vector.extract_strided_slice %176 {offsets = [96, 0], sizes = [32, 4], strides = [1, 1]} : vector<128x4xf32> to vector<32x4xf32>
    %181 = arith.mulf %178, %164 : vector<32x4xf32>
    %182 = arith.mulf %177, %179 : vector<32x4xf32>
    %183 = arith.addf %181, %182 : vector<32x4xf32>
    %184 = math.tanh %183 : vector<32x4xf32>
    %185 = arith.mulf %180, %184 : vector<32x4xf32>
    %c0_49 = arith.constant 0 : index
    %c0_50 = arith.constant 0 : index
    %186 = vector.load %arg5[%c0_49, %c0_50] : memref<32x5xf32, #tpu.memory_space<vmem>>, vector<32x5xf32>
    %c0_51 = arith.constant 0 : index
    %c0_52 = arith.constant 0 : index
    %187 = vector.load %arg2[%c0_51, %c0_52] : memref<5x4xf32, #tpu.memory_space<vmem>>, vector<5x4xf32>
    %cst_53 = arith.constant dense<0.000000e+00> : vector<32x4xf32>
    %188 = tpu.matmul %186, %187, %cst_53 {dimension_numbers = #tpu.dot_dimension_numbers<[1], [0], [0], [1], [0, 0, 1, 1], [], []>} : vector<32x5xf32>, vector<5x4xf32>, vector<32x4xf32> -> vector<32x4xf32>
    %c0_54 = arith.constant 0 : index
    %c0_55 = arith.constant 0 : index
    %189 = vector.load %arg6[%c0_54, %c0_55] : memref<32x32xf32, #tpu.memory_space<vmem>>, vector<32x32xf32>
    %cst_56 = arith.constant dense<0.000000e+00> : vector<32x4xf32>
    %190 = tpu.matmul %189, %185, %cst_56 {dimension_numbers = #tpu.dot_dimension_numbers<[1], [0], [0], [1], [0, 0, 1, 1], [], []>} : vector<32x32xf32>, vector<32x4xf32>, vector<32x4xf32> -> vector<32x4xf32>
    %191 = arith.addf %188, %190 : vector<32x4xf32>
    %192 = vector.broadcast %3 : vector<32x1xf32> to vector<32x4xf32>
    %193 = arith.addf %191, %192 : vector<32x4xf32>
    %cst_57 = arith.constant 0.000000e+00 : f32
    %194 = vector.broadcast %cst_57 : f32 to vector<32x4xf32>
    %195 = arith.cmpf oge, %193, %194 : vector<32x4xf32>
    %cst_58 = arith.constant 0.00999999977 : f32
    %196 = vector.broadcast %cst_58 : f32 to vector<32x4xf32>
    %197 = arith.mulf %196, %193 : vector<32x4xf32>
    %198 = arith.select %195, %193, %197 : vector<32x4xi1>, vector<32x4xf32>
    %c0_59 = arith.constant 0 : index
    %c0_60 = arith.constant 0 : index
    %199 = vector.load %arg7[%c0_59, %c0_60] : memref<1x32xf32, #tpu.memory_space<vmem>>, vector<1x32xf32>
    %cst_61 = arith.constant dense<0.000000e+00> : vector<1x4xf32>
    %200 = tpu.matmul %199, %198, %cst_61 {dimension_numbers = #tpu.dot_dimension_numbers<[1], [0], [0], [1], [0, 0, 1, 1], [], []>} : vector<1x32xf32>, vector<32x4xf32>, vector<1x4xf32> -> vector<1x4xf32>
    %201 = vector.broadcast %4 : vector<1x1xf32> to vector<1x4xf32>
    %202 = arith.addf %200, %201 : vector<1x4xf32>
    %203 = arith.negf %202 : vector<1x4xf32>
    %204 = math.exp %203 : vector<1x4xf32>
    %cst_62 = arith.constant 1.000000e+00 : f32
    %205 = vector.broadcast %cst_62 : f32 to vector<1x4xf32>
    %206 = arith.addf %205, %204 : vector<1x4xf32>
    %207 = arith.divf %205, %206 : vector<1x4xf32>
    %c0_63 = arith.constant 0 : index
    %c0_64 = arith.constant 0 : index
    %208 = vector.load %arg9[%c0_63, %c0_64] : memref<1x4xf32, #tpu.memory_space<vmem>>, vector<1x4xf32>
    tpu.vector_store %arg9[%c0_63, %c0_64], %207 {strides = array<i32>} : memref<1x4xf32, #tpu.memory_space<vmem>>, vector<1x4xf32>,
    return
  }
  func.func @transform_0(%arg0: i32) -> (i32, i32, i32) {
    %c0_i32 = arith.constant 0 : i32
    %c0_i32_0 = arith.constant 0 : i32
    %c0_i32_1 = arith.constant 0 : i32
    return %c0_i32, %c0_i32_0, %arg0 : i32, i32, i32
  }
  func.func @transform_1(%arg0: i32) -> (i32, i32) {
    %c0_i32 = arith.constant 0 : i32
    %c0_i32_0 = arith.constant 0 : i32
    return %c0_i32, %arg0 : i32, i32
  }
  func.func @transform_2(%arg0: i32) -> (i32, i32) {
    %c0_i32 = arith.constant 0 : i32
    %c0_i32_0 = arith.constant 0 : i32
    %c0_i32_1 = arith.constant 0 : i32
    return %c0_i32, %c0_i32_0 : i32, i32
  }
  func.func @transform_3(%arg0: i32) -> (i32, i32) {
    %c0_i32 = arith.constant 0 : i32
    %c0_i32_0 = arith.constant 0 : i32
    %c0_i32_1 = arith.constant 0 : i32
    return %c0_i32, %c0_i32_0 : i32, i32
  }
  func.func @transform_4(%arg0: i32) -> (i32, i32) {
    %c0_i32 = arith.constant 0 : i32
    %c0_i32_0 = arith.constant 0 : i32
    %c0_i32_1 = arith.constant 0 : i32
    return %c0_i32, %c0_i32_0 : i32, i32
  }
  func.func @transform_5(%arg0: i32) -> (i32, i32) {
    %c0_i32 = arith.constant 0 : i32
    %c0_i32_0 = arith.constant 0 : i32
    %c0_i32_1 = arith.constant 0 : i32
    return %c0_i32, %c0_i32_0 : i32, i32
  }
  func.func @transform_6(%arg0: i32) -> (i32, i32) {
    %c0_i32 = arith.constant 0 : i32
    %c0_i32_0 = arith.constant 0 : i32
    %c0_i32_1 = arith.constant 0 : i32
    return %c0_i32, %c0_i32_0 : i32, i32
  }
  func.func @transform_7(%arg0: i32) -> (i32, i32) {
    %c0_i32 = arith.constant 0 : i32
    %c0_i32_0 = arith.constant 0 : i32
    %c0_i32_1 = arith.constant 0 : i32
    return %c0_i32, %c0_i32_0 : i32, i32
  }
  func.func @transform_8(%arg0: i32) -> (i32, i32) {
    %c0_i32 = arith.constant 0 : i32
    %c0_i32_0 = arith.constant 0 : i32
    return %arg0, %c0_i32 : i32, i32
  }
}

</mosaic_0001>

<bundles_post_ra>
// kernel: tpu_custom_call.1
= control target key start
LH: loop header
LB: loop body
LE: loop exit
PB: predicated region body
PF: predicated region fallthrough
CT: control target
= control target key end

     0   :  { %vm209_vm0 = vcmask 1045504   ;;  %vm160_vm1 = vcmask 48128   ;;  %v5987_v14 = vmov 0   ;;  %s7178_s0 = inlined_call_operand.vmem [shape: f32[7,6,4], index: 0, kind: input, shape index: {}]   ;;  %s7179_s1 = inlined_call_operand.vmem [shape: f32[5,4], index: 1, kind: input, shape index: {}]   ;;  %s7180_s2 = inlined_call_operand.vmem [shape: f32[128,6], index: 2, kind: input, shape index: {}]   ;;  %s7181_s3 = inlined_call_operand.vmem [shape: f32[128,32], index: 3, kind: input, shape index: {}]   ;;  %s7182_s4 = inlined_call_operand.vmem [shape: f32[32,5], index: 4, kind: input, shape index: {}]   ;;  %s7183_s5 = inlined_call_operand.vmem [shape: f32[32,32], index: 5, kind: input, shape index: {}]   ;;  %s7184_s6 = inlined_call_operand.vmem [shape: f32[1,32], index: 6, kind: input, shape index: {}]   ;;  %s7185_s7 = inlined_call_operand.vmem [shape: f32[128,3], index: 7, kind: input, shape index: {}]   ;;  %s7186_s8 = inlined_call_operand.hbm [shape: f32[1,4], index: 8, kind: output, shape index: {}]  }
   0x1   :  { %v79_v0 = vld [vmem:[%s7178_s0] sm:$0x3f]  ;;  %v6050_v2 = vld [vmem:[%s7180_s2 + $0x8] sm:$0xff]  ;;  %v6058_v3 = vld [vmem:[%s7180_s2 + $0x10] sm:$0xff]  ;;  %5415 = vset.pattern.permute.xlu1 %v5987_v14  ;;  %5414 = vset.pattern.permute.xlu0 %v5987_v14 }
   0x2   :  { %v6045_v1 = vld [vmem:[%s7180_s2] sm:$0xff]  ;;  %4682 = vmatprep.subr.msk.mxu0 %vm209_vm0, %v79_v0  ;;  %v4055_v4 = vld [vmem:[%s7178_s0 + $0x10] sm:$0x3f]  ;;  %5177 = vmatprep.subr.msk.mxu1 %vm209_vm0, %v79_v0  ;;  %v6073_v5 = vld [vmem:[%s7180_s2 + $0x18] sm:$0xff] }
   0x3   :  { %4684 = vmatprep.mubr.msk.f32.mxu0 %vm160_vm1, %v6045_v1  ;;  %4683 = vmatpush3.msk.msra.mxu0 %vm209_vm0, %v79_v0  ;;  %v6079_v6 = vld [vmem:[%s7180_s2 + $0x30] sm:$0xff]  ;;  %v6084_v7 = vld [vmem:[%s7180_s2 + $0x20] sm:$0xff]  ;;  %v6089_v8 = vld [vmem:[%s7180_s2 + $0x38] sm:$0xff] }
   0x4   :  { %4685 = vmatmul.mubr.msk.f32.vlgmr.msra.gmra.mrb[0].mxu0 %vm160_vm1, %v6050_v2  ;;  %4734 = vmatprep.subr.msk.mxu0 %vm209_vm0, %v4055_v4  ;;  %v4091_v9 = vld [vmem:[%s7178_s0 + $0x20] sm:$0x3f]  ;;  %v6114_v11 = vld [vmem:[%s7180_s2 + $0x28] sm:$0xff]  ;;  %v6124_v13 = vld [vmem:[%s7180_s2 + $0x50] sm:$0xff] }
   0x5   :  { %4687 = vmatprep.mubr.msk.f32.mxu0 %vm160_vm1, %v6058_v3  ;;  %4735 = vmatpush3.msk.msra.mxu0 %vm209_vm0, %v4055_v4  ;;  %v6100_v10 = vld [vmem:[%s7180_s2 + $0x40] sm:$0xff]  ;;  %v6119_v12 = vld [vmem:[%s7180_s2 + $0x48] sm:$0xff]  ;;  %v72_v15 = vld [vmem:[%s7185_s7 + $0x50] sm:$0xff] }
   0x6   :  { %5178 = vmatpush3.msk.msra.mxu1 %vm209_vm0, %v79_v0  ;;  %4693 = vmatprep.mubr.msk.f32.mxu1 %vm160_vm1, %v6079_v6  ;;  %v70_v16 = vld [vmem:[%s7185_s7 + $0x40] sm:$0xff]  ;;  %v6143_v17 = vld [vmem:[%s7180_s2 + $0x58] sm:$0xff]  ;;  %v6153_v19 = vld [vmem:[%s7178_s0 + $0x30] sm:$0x3f] }
   0x7   :  { %4786 = vmatprep.subr.msk.mxu0 %vm209_vm0, %v4091_v9  ;;  %4694 = vmatmul.mubr.msk.f32.vlgmr.msra.gmra.mrb[0].mxu1 %vm160_vm1, %v6089_v8  ;;  %v6148_v18 = vld [vmem:[%s7180_s2 + $0x60] sm:$0xff]  ;;  %v73_v20 = vld [vmem:[%s7185_s7 + $0x58] sm:$0xff]  ;;  %v71_v21 = vld [vmem:[%s7185_s7 + $0x48] sm:$0xff] }
   0x8   :  { %4688 = vmatmul.mubr.msk.f32.gmra.mrb[2].mxu0 %vm160_vm1, %v6073_v5  ;;  %4696 = vmatprep.mubr.msk.f32.mxu1 %vm160_vm1, %v6100_v10  ;;  %v6173_v22 = vld [vmem:[%s7180_s2 + $0x68] sm:$0xff] }
   0x9   :  { %4690 = vmatprep.mubr.msk.f32.mxu0 %vm160_vm1, %v6084_v7  ;;  %132 = vperm.xlu1 %5415, %v72_v15   ;;  %v4037_v23 = vld [vmem:[%s7178_s0 + $0x8] sm:$0x3f] }
   0xa   :  { %122 = vperm.xlu0 %5414, %v70_v16  }
   0xb   :  { %4697 = vmatmul.mubr.msk.f32.gmra.mrb[2].mxu1 %vm160_vm1, %v6119_v12 }
   0xc   :  { %4691 = vmatmul.mubr.msk.f32.gmra.mrb[4].mxu0 %vm160_vm1, %v6114_v11  ;;  %4699 = vmatprep.mubr.msk.f32.mxu1 %vm160_vm1, %v6124_v13 }
   0xd   :  { %4736 = vmatprep.mubr.msk.f32.mxu0 %vm160_vm1, %v6045_v1  ;;  %137 = vperm.xlu1 %5415, %v73_v20  }
   0xf   :  { %4700 = vmatmul.mubr.msk.f32.gmra.mrb[4].mxu1 %vm160_vm1, %v6143_v17 }
  0x10   :  { %4737 = vmatmul.mubr.msk.f32.vlgmr.msra.gmra.mrb[6].mxu0 %vm160_vm1, %v6050_v2  ;;  %4702 = vmatprep.mubr.msk.f32.mxu1 %vm160_vm1, %v6148_v18 }
  0x11   :  { %4739 = vmatprep.mubr.msk.f32.mxu0 %vm160_vm1, %v6058_v3  ;;  %4787 = vmatpush3.msk.msra.mxu0 %vm209_vm0, %v4091_v9 }
  0x12   :  { %4838 = vmatprep.subr.msk.mxu0 %vm209_vm0, %v6153_v19 }
  0x13   :  { %13 = vsyncpa [#allocation3], 0  ;;  %v6183_v24 = vld [vmem:[%s7180_s2 + $0x70] sm:$0xff]  ;;  %4703 = vmatmul.mubr.msk.f32.gmra.mrb[6].mxu1 %vm160_vm1, %v6173_v22  ;;  %127 = vperm.xlu0 %5414, %v71_v21   ;;  %v63_v25 = vld [vmem:[%s7185_s7 + $0x8] sm:$0xff]  ;;  %v5988_v38 = vmov 0.0   ;;  %vm1355_vm2 = vcmask 261120  }
  0x14   :  { %4740 = vmatmul.mubr.msk.f32.gmra.mrb[8].mxu0 %vm160_vm1, %v6073_v5  ;;  %4705 = vmatprep.mubr.msk.f32.mxu1 %vm160_vm1, %v6183_v24  ;;  %v62_v26 = vld [vmem:[%s7185_s7] sm:$0xff]  ;;  %v6203_v27 = vld [vmem:[%s7180_s2 + $0x78] sm:$0xff]  ;;  %v67_v28 = vld [vmem:[%s7185_s7 + $0x28] sm:$0xff]  ;;  %vm3798_vm3 = vcmask 1044480   ;;  %vm3785_vm4 = vcmask 39936   ;;  %vm5991_vm5 = vmmov 0  }
  0x15   :  { %4742 = vmatprep.mubr.msk.f32.mxu0 %vm160_vm1, %v6084_v7  ;;  %4708 = vmatprep.subr.msk.mxu1 %vm209_vm0, %v4037_v23  ;;  %v66_v29 = vld [vmem:[%s7185_s7 + $0x20] sm:$0xff]  ;;  %v69_v30 = vld [vmem:[%s7185_s7 + $0x38] sm:$0xff]  ;;  %v68_v31 = vld [vmem:[%s7185_s7 + $0x30] sm:$0xff]  ;;  %s5993_s16 = smov [#allocation2]   ;;  %vm4004_vm10 = vcmask 24576  }
  0x16   :  { %87 = vperm.xlu1 %5415, %v63_v25   ;;  %4709 = vmatpush3.msk.msra.mxu1 %vm209_vm0, %v4037_v23  ;;  %v65_v32 = vld [vmem:[%s7185_s7 + $0x18] sm:$0xff]  ;;  %v64_v33 = vld [vmem:[%s7185_s7 + $0x10] sm:$0xff]  ;;  %v75_v34 = vld [vmem:[%s7185_s7 + $0x68] sm:$0xff]  ;;  %s4012_s17 = sshll.u32 %s5993_s16, 4  ;;  %s4013_s17 = int_to_ptr.vmem [resolvable:$true] %s4012_s17 }
  0x17   :  { %4706 = vmatmul.mubr.msk.f32.gmra.mrb[8].mxu1 %vm160_vm1, %v6203_v27  ;;  %82 = vperm.xlu0 %5414, %v62_v26   ;;  %v74_v35 = vld [vmem:[%s7185_s7 + $0x60] sm:$0xff]  ;;  %v77_v36 = vld [vmem:[%s7185_s7 + $0x78] sm:$0xff]  ;;  %v76_v37 = vld [vmem:[%s7185_s7 + $0x70] sm:$0xff]  ;;  %s5963_s18 = scalar_lea.vmem %s4013_s17, 16  ;;  %p5968_p1 = scmp.lt.s32.totalorder %s4013_s17, %s4013_s17 }
  0x18   :  { %4743 = vmatmul.mubr.msk.f32.gmra.mrb[10].mxu0 %vm160_vm1, %v6114_v11  ;;  %4710 = vmatprep.mubr.msk.f32.mxu1 %vm160_vm1, %v6045_v1  ;;  %v6363_v39 = vld [vmem:[%s7181_s3] sm:$0xff]  ;;  %v6372_v40 = vld [vmem:[%s7181_s3 + $0x8] sm:$0xff]  ;;  %v6377_v41 = vld [vmem:[%s7181_s3 + $0x10] sm:$0xff]  ;;  %p5964_p0 = scmp.ne.s32.totalorder %s4013_s17, %s5963_s18 }
  0x19   :  { %4745 = vmatprep.mubr.msk.f32.mxu0 %vm160_vm1, %v6079_v6  ;;  %v6386_v42 = vld [vmem:[%s7181_s3 + $0x18] sm:$0xff]  ;;  %v6391_v43 = vld [vmem:[%s7181_s3 + $0x20] sm:$0xff]  ;;  %v6400_v44 = vld [vmem:[%s7181_s3 + $0x28] sm:$0xff] }
  0x1a   :  { %107 = vperm.xlu1 %5415, %v67_v28   ;;  %v6405_v45 = vld [vmem:[%s7181_s3 + $0x30] sm:$0xff]  ;;  %v6414_v46 = vld [vmem:[%s7181_s3 + $0x38] sm:$0xff]  ;;  %v6419_v47 = vld [vmem:[%s7181_s3 + $0x40] sm:$0xff] }
  0x1b   :  { %102 = vperm.xlu0 %5414, %v66_v29   ;;  %4711 = vmatmul.mubr.msk.f32.vlgmr.msra.gmra.mrb[10].mxu1 %vm160_vm1, %v6050_v2  ;;  %v6428_v48 = vld [vmem:[%s7181_s3 + $0x48] sm:$0xff]  ;;  %v6433_v49 = vld [vmem:[%s7181_s3 + $0x50] sm:$0xff]  ;;  %v6442_v50 = vld [vmem:[%s7181_s3 + $0x58] sm:$0xff] }
  0x1c   :  { %4746 = vmatmul.mubr.msk.f32.gmra.mrb[12].mxu0 %vm160_vm1, %v6089_v8  ;;  %4713 = vmatprep.mubr.msk.f32.mxu1 %vm160_vm1, %v6058_v3  ;;  %v6447_v51 = vld [vmem:[%s7181_s3 + $0x60] sm:$0xff]  ;;  %v6456_v52 = vld [vmem:[%s7181_s3 + $0x68] sm:$0xff]  ;;  %v6461_v53 = vld [vmem:[%s7181_s3 + $0x70] sm:$0xff] }
  0x1d   :  { %4748 = vmatprep.mubr.msk.f32.mxu0 %vm160_vm1, %v6100_v10  ;;  %v6470_v54 = vld [vmem:[%s7181_s3 + $0x78] sm:$0xff]  ;;  %v4109_v9 = vld [vmem:[%s7178_s0 + $0x28] sm:$0x3f] }
  0x1e   :  { %117 = vperm.xlu1 %5415, %v69_v30   ;;  %v4073_v55 = vld [vmem:[%s7178_s0 + $0x18] sm:$0x3f] }
  0x1f   :  { %112 = vperm.xlu0 %5414, %v68_v31   ;;  %4714 = vmatmul.mubr.msk.f32.gmra.mrb[12].mxu1 %vm160_vm1, %v6073_v5 }
  0x20   :  { %4749 = vmatmul.mubr.msk.f32.gmra.mrb[14].mxu0 %vm160_vm1, %v6119_v12  ;;  %4716 = vmatprep.mubr.msk.f32.mxu1 %vm160_vm1, %v6084_v7 }
  0x21   :  { %4751 = vmatprep.mubr.msk.f32.mxu0 %vm160_vm1, %v6124_v13  ;;  %4760 = vmatprep.subr.msk.mxu1 %vm209_vm0, %v4073_v55 }
  0x22   :  { %97 = vperm.xlu1 %5415, %v65_v32   ;;  %4761 = vmatpush3.msk.msra.mxu1 %vm209_vm0, %v4073_v55 }
  0x23   :  { %92 = vperm.xlu0 %5414, %v64_v33   ;;  %4717 = vmatmul.mubr.msk.f32.gmra.mrb[14].mxu1 %vm160_vm1, %v6114_v11 }
  0x24   :  { %4752 = vmatmul.mubr.msk.f32.gmra.mrb[16].mxu0 %vm160_vm1, %v6143_v17  ;;  %4719 = vmatprep.mubr.msk.f32.mxu1 %vm160_vm1, %v6079_v6 }
  0x25   :  { %4754 = vmatprep.mubr.msk.f32.mxu0 %vm160_vm1, %v6148_v18  ;;  %4812 = vmatprep.subr.msk.mxu1 %vm209_vm0, %v4109_v9 }
  0x26   :  { %147 = vperm.xlu1 %5415, %v75_v34  }
  0x27   :  { %142 = vperm.xlu0 %5414, %v74_v35   ;;  %4720 = vmatmul.mubr.msk.f32.gmra.mrb[16].mxu1 %vm160_vm1, %v6089_v8 }
  0x28   :  { %4755 = vmatmul.mubr.msk.f32.gmra.mrb[18].mxu0 %vm160_vm1, %v6173_v22  ;;  %4722 = vmatprep.mubr.msk.f32.mxu1 %vm160_vm1, %v6100_v10 }
  0x29   :  { %4757 = vmatprep.mubr.msk.f32.mxu0 %vm160_vm1, %v6183_v24 }
  0x2a   :  { %157 = vperm.xlu1 %5415, %v77_v36  }
  0x2b   :  { %152 = vperm.xlu0 %5414, %v76_v37   ;;  %4723 = vmatmul.mubr.msk.f32.gmra.mrb[18].mxu1 %vm160_vm1, %v6119_v12 }
  0x2c   :  { %4758 = vmatmul.mubr.msk.f32.gmra.mrb[20].mxu0 %vm160_vm1, %v6203_v27  ;;  %4725 = vmatprep.mubr.msk.f32.mxu1 %vm160_vm1, %v6124_v13 }
  0x2d   :  { %4788 = vmatprep.mubr.msk.f32.mxu0 %vm160_vm1, %v6045_v1 }
  0x2f   :  { %4726 = vmatmul.mubr.msk.f32.gmra.mrb[20].mxu1 %vm160_vm1, %v6143_v17 }
  0x30   :  { %4789 = vmatmul.mubr.msk.f32.vlgmr.msra.gmra.mrb[22].mxu0 %vm160_vm1, %v6050_v2  ;;  %4728 = vmatprep.mubr.msk.f32.mxu1 %vm160_vm1, %v6148_v18 }
  0x31   :  { %4791 = vmatprep.mubr.msk.f32.mxu0 %vm160_vm1, %v6058_v3  ;;  %4839 = vmatpush3.msk.msra.mxu0 %vm209_vm0, %v6153_v19 }
  0x32   :  { %4864 = vmatprep.subr.mxu0 %v5988_v38 }
  0x33   :  { %4729 = vmatmul.mubr.msk.f32.gmra.mrb[22].mxu1 %vm160_vm1, %v6173_v22 }
  0x34   :  { %4792 = vmatmul.mubr.msk.f32.gmra.mrb[24].mxu0 %vm160_vm1, %v6073_v5  ;;  %4731 = vmatprep.mubr.msk.f32.mxu1 %vm160_vm1, %v6183_v24 }
  0x35   :  { %4794 = vmatprep.mubr.msk.f32.mxu0 %vm160_vm1, %v6084_v7 }
  0x37   :  { %4732 = vmatmul.mubr.msk.f32.gmra.mrb[24].mxu1 %vm160_vm1, %v6203_v27 }
  0x38   :  { %4795 = vmatmul.mubr.msk.f32.gmra.mrb[26].mxu0 %vm160_vm1, %v6114_v11  ;;  %4762 = vmatprep.mubr.msk.f32.mxu1 %vm160_vm1, %v6045_v1 }
  0x39   :  { %4797 = vmatprep.mubr.msk.f32.mxu0 %vm160_vm1, %v6079_v6 }
  0x3b   :  { %4763 = vmatmul.mubr.msk.f32.vlgmr.msra.gmra.mrb[26].mxu1 %vm160_vm1, %v6050_v2 }
  0x3c   :  { %4798 = vmatmul.mubr.msk.f32.gmra.mrb[28].mxu0 %vm160_vm1, %v6089_v8  ;;  %4765 = vmatprep.mubr.msk.f32.mxu1 %vm160_vm1, %v6058_v3 }
  0x3d   :  { %4800 = vmatprep.mubr.msk.f32.mxu0 %vm160_vm1, %v6100_v10  ;;  %4813 = vmatpush3.msk.msra.mxu1 %vm209_vm0, %v4109_v9 }
  0x3f   :  { %4766 = vmatmul.mubr.msk.f32.gmra.mrb[28].mxu1 %vm160_vm1, %v6073_v5 }
  0x40   :  { %4801 = vmatmul.mubr.msk.f32.gmra.mrb[30].mxu0 %vm160_vm1, %v6119_v12  ;;  %4768 = vmatprep.mubr.msk.f32.mxu1 %vm160_vm1, %v6084_v7 }
  0x41   :  { %4803 = vmatprep.mubr.msk.f32.mxu0 %vm160_vm1, %v6124_v13 }
  0x43   :  { %4769 = vmatmul.mubr.msk.f32.gmra.mrb[30].mxu1 %vm160_vm1, %v6114_v11 }
  0x44   :  { %4804 = vmatmul.mubr.msk.f32.gmra.mrb[32].mxu0 %vm160_vm1, %v6143_v17  ;;  %4771 = vmatprep.mubr.msk.f32.mxu1 %vm160_vm1, %v6079_v6 }
  0x45   :  { %4806 = vmatprep.mubr.msk.f32.mxu0 %vm160_vm1, %v6148_v18 }
  0x47   :  { %4772 = vmatmul.mubr.msk.f32.gmra.mrb[32].mxu1 %vm160_vm1, %v6089_v8 }
  0x48   :  { %4807 = vmatmul.mubr.msk.f32.gmra.mrb[34].mxu0 %vm160_vm1, %v6173_v22  ;;  %4774 = vmatprep.mubr.msk.f32.mxu1 %vm160_vm1, %v6100_v10 }
  0x49   :  { %4809 = vmatprep.mubr.msk.f32.mxu0 %vm160_vm1, %v6183_v24 }
  0x4b   :  { %4775 = vmatmul.mubr.msk.f32.gmra.mrb[34].mxu1 %vm160_vm1, %v6119_v12 }
  0x4c   :  { %4810 = vmatmul.mubr.msk.f32.gmra.mrb[36].mxu0 %vm160_vm1, %v6203_v27  ;;  %4777 = vmatprep.mubr.msk.f32.mxu1 %vm160_vm1, %v6124_v13 }
  0x4d   :  { %4840 = vmatprep.mubr.msk.f32.mxu0 %vm160_vm1, %v6045_v1 }
  0x4f   :  { %4778 = vmatmul.mubr.msk.f32.gmra.mrb[36].mxu1 %vm160_vm1, %v6143_v17 }
  0x50   :  { %4841 = vmatmul.mubr.msk.f32.vlgmr.msra.gmra.mrb[38].mxu0 %vm160_vm1, %v6050_v2  ;;  %4780 = vmatprep.mubr.msk.f32.mxu1 %vm160_vm1, %v6148_v18 }
  0x51   :  { %4843 = vmatprep.mubr.msk.f32.mxu0 %vm160_vm1, %v6058_v3  ;;  %4865 = vmatpush3.msra.mxu0 %v5988_v38 }
  0x53   :  { %4781 = vmatmul.mubr.msk.f32.gmra.mrb[38].mxu1 %vm160_vm1, %v6173_v22 }
  0x54   :  { %4844 = vmatmul.mubr.msk.f32.gmra.mrb[40].mxu0 %vm160_vm1, %v6073_v5  ;;  %4783 = vmatprep.mubr.msk.f32.mxu1 %vm160_vm1, %v6183_v24 }
  0x55   :  { %4846 = vmatprep.mubr.msk.f32.mxu0 %vm160_vm1, %v6084_v7 }
  0x57   :  { %4784 = vmatmul.mubr.msk.f32.gmra.mrb[40].mxu1 %vm160_vm1, %v6203_v27 }
  0x58   :  { %4847 = vmatmul.mubr.msk.f32.gmra.mrb[42].mxu0 %vm160_vm1, %v6114_v11  ;;  %4814 = vmatprep.mubr.msk.f32.mxu1 %vm160_vm1, %v6045_v1 }
  0x59   :  { %4849 = vmatprep.mubr.msk.f32.mxu0 %vm160_vm1, %v6079_v6 }
  0x5b   :  { %4815 = vmatmul.mubr.msk.f32.vlgmr.msra.gmra.mrb[42].mxu1 %vm160_vm1, %v6050_v2 }
  0x5c   :  { %4850 = vmatmul.mubr.msk.f32.gmra.mrb[44].mxu0 %vm160_vm1, %v6089_v8  ;;  %4817 = vmatprep.mubr.msk.f32.mxu1 %vm160_vm1, %v6058_v3 }
  0x5d   :  { %4852 = vmatprep.mubr.msk.f32.mxu0 %vm160_vm1, %v6100_v10 }
  0x5f   :  { %4818 = vmatmul.mubr.msk.f32.gmra.mrb[44].mxu1 %vm160_vm1, %v6073_v5 }
  0x60   :  { %4853 = vmatmul.mubr.msk.f32.gmra.mrb[46].mxu0 %vm160_vm1, %v6119_v12  ;;  %4820 = vmatprep.mubr.msk.f32.mxu1 %vm160_vm1, %v6084_v7 }
  0x61   :  { %4855 = vmatprep.mubr.msk.f32.mxu0 %vm160_vm1, %v6124_v13 }
  0x63   :  { %4821 = vmatmul.mubr.msk.f32.gmra.mrb[46].mxu1 %vm160_vm1, %v6114_v11 }
  0x64   :  { %4856 = vmatmul.mubr.msk.f32.gmra.mrb[48].mxu0 %vm160_vm1, %v6143_v17  ;;  %4823 = vmatprep.mubr.msk.f32.mxu1 %vm160_vm1, %v6079_v6 }
  0x65   :  { %4858 = vmatprep.mubr.msk.f32.mxu0 %vm160_vm1, %v6148_v18 }
  0x67   :  { %4824 = vmatmul.mubr.msk.f32.gmra.mrb[48].mxu1 %vm160_vm1, %v6089_v8 }
  0x68   :  { %4859 = vmatmul.mubr.msk.f32.gmra.mrb[50].mxu0 %vm160_vm1, %v6173_v22  ;;  %4826 = vmatprep.mubr.msk.f32.mxu1 %vm160_vm1, %v6100_v10 }
  0x69   :  { %4861 = vmatprep.mubr.msk.f32.mxu0 %vm160_vm1, %v6183_v24 }
  0x6b   :  { %4827 = vmatmul.mubr.msk.f32.gmra.mrb[50].mxu1 %vm160_vm1, %v6119_v12 }
  0x6c   :  { %4862 = vmatmul.mubr.msk.f32.gmra.mrb[52].mxu0 %vm160_vm1, %v6203_v27  ;;  %4829 = vmatprep.mubr.msk.f32.mxu1 %vm160_vm1, %v6124_v13 }
  0x6d   :  { %4866 = vmatprep.mubr.msk.f32.mxu0 %vm1355_vm2, %v6363_v39 }
  0x6f   :  { %4830 = vmatmul.mubr.msk.f32.gmra.mrb[52].mxu1 %vm160_vm1, %v6143_v17 }
  0x70   :  { %4867 = vmatmul.mubr.msk.f32.vlgmr.msra.gmra.mrb[0].mxu0 %vm1355_vm2, %v6372_v40  ;;  %4832 = vmatprep.mubr.msk.f32.mxu1 %vm160_vm1, %v6148_v18 }
  0x71   :  { %4869 = vmatprep.mubr.msk.f32.mxu0 %vm1355_vm2, %v6377_v41 }
  0x73   :  { %4833 = vmatmul.mubr.msk.f32.gmra.mrb[54].mxu1 %vm160_vm1, %v6173_v22 }
  0x74   :  { %4870 = vmatmul.mubr.msk.f32.gmra.mrb[2].mxu0 %vm1355_vm2, %v6386_v42  ;;  %4835 = vmatprep.mubr.msk.f32.mxu1 %vm160_vm1, %v6183_v24 }
  0x75   :  { %4872 = vmatprep.mubr.msk.f32.mxu0 %vm1355_vm2, %v6391_v43 }
  0x77   :  { %4836 = vmatmul.mubr.msk.f32.gmra.mrb[56].mxu1 %vm160_vm1, %v6203_v27 }
  0x78   :  { %4873 = vmatmul.mubr.msk.f32.gmra.mrb[4].mxu0 %vm1355_vm2, %v6400_v44  ;;  %4898 = vmatprep.mubr.msk.f32.mxu1 %vm1355_vm2, %v6363_v39 }
  0x79   :  { %4875 = vmatprep.mubr.msk.f32.mxu0 %vm1355_vm2, %v6405_v45 }
  0x7c   :  { %4876 = vmatmul.mubr.msk.f32.gmra.mrb[54].mxu0 %vm1355_vm2, %v6414_v46 }
  0x7d   :  { %4878 = vmatprep.mubr.msk.f32.mxu0 %vm1355_vm2, %v6419_v47 }
  0x80   :  { %4879 = vmatmul.mubr.msk.f32.gmra.mrb[56].mxu0 %vm1355_vm2, %v6428_v48 }
  0x81   :  { %4881 = vmatprep.mubr.msk.f32.mxu0 %vm1355_vm2, %v6433_v49 }
  0x84   :  { %4882 = vmatmul.mubr.msk.f32.gmra.mrb[58].mxu0 %vm1355_vm2, %v6442_v50 }
  0x85   :  { %4884 = vmatprep.mubr.msk.f32.mxu0 %vm1355_vm2, %v6447_v51 }
  0x88   :  { %4885 = vmatmul.mubr.msk.f32.gmra.mrb[60].mxu0 %vm1355_vm2, %v6456_v52  ;;  %v6568_v1 = vpop.permute.xlu1 %132 }
  0x89   :  { %4887 = vmatprep.mubr.msk.f32.mxu0 %vm1355_vm2, %v6461_v53  ;;  %v6570_v2 = vpop.permute.xlu0 %122 }
  0x8c   :  { %4888 = vmatmul.mubr.msk.f32.gmra.mrb[62].mxu0 %vm1355_vm2, %v6470_v54  ;;  %v6572_v3 = vpop.permute.xlu1 %137 }
  0x8d   :  { %4930 = vmatprep.mubr.msk.f32.mxu0 %vm1355_vm2, %v6363_v39 }
  0x92   :  { %v6574_v5 = vpop.permute.xlu0 %127 }
  0x95   :  { %v6576_v6 = vpop.permute.xlu1 %87 }
  0x96   :  { %v6578_v7 = vpop.permute.xlu0 %82 }
  0x99   :  { %v6580_v8 = vpop.permute.xlu1 %107 }
  0x9a   :  { %v6582_v11 = vpop.permute.xlu0 %102 }
  0x9d   :  { %v6584_v15 = vpop.permute.xlu1 %117 }
  0x9e   :  { %v6587_v17 = vpop.permute.xlu0 %112 }
  0xa1   :  { %v6593_v26 = vpop.permute.xlu1 %97 }
  0xa2   :  { %v6597_v30 = vpop.permute.xlu0 %92 }
  0xda   :  { %v4695_v56 = vpop.f32.mrb[0].mxu1 }
  0xdb   :  { %v6491_v57 = vpop.f32.mrb[1].mxu1  ;;  %v315_v24 = vadd.f32 %v4695_v56, %v6584_v15 }
  0xdc   :  { %v310_v27 = vadd.f32 %v6491_v57, %v6587_v17 }
  0xde   :  { %v6495_v58 = vpop.f32.mrb[2].mxu1 }
  0xdf   :  { %v6499_v59 = vpop.f32.mrb[3].mxu1  ;;  %v325_v36 = vadd.f32 %v6495_v58, %v6574_v5 }
  0xe0   :  { %v320_v55 = vadd.f32 %v6499_v59, %v6570_v2 }
  0xe2   :  { %v6503_v60 = vpop.f32.mrb[4].mxu1 }
  0xe3   :  { %v6507_v61 = vpop.f32.mrb[5].mxu1 }
  0xe6   :  { %v6511_v62 = vpop.f32.mrb[6].mxu1 }
  0xe7   :  { %v6515_v63 = vpop.f32.mrb[7].mxu1 }
  0xea   :  { %v6519_v0 = vpop.f32.mrb[8].mxu1 }
  0xeb   :  { %v6523_v4 = vpop.f32.mrb[9].mxu1 }
 0x143   :  { %v4868_v10 = vpop.f32.mrb[0].mxu0 }
 0x144   :  { %v1470_v12 = vpop.f32.mrb[1].mxu0  ;;  %v5179_v16 = vadd.f32 %v4868_v10, %v6576_v6  ;;  %v6605_v10 = vpop.permute.xlu1 %147 }
 0x145   :  { %v5180_v18 = vadd.f32 %v1470_v12, %v6578_v7 }
 0x146   :  { %v4166_v22 = vmul.f32 -1.442695, %v5179_v16 }
 0x147   :  { %v4871_v13 = vpop.f32.mrb[2].mxu0  ;;  %v4165_v25 = vmul.f32 -1.442695, %v5180_v18  ;;  %v6609_v18 = vpop.permute.xlu0 %142 }
 0x148   :  { %v1480_v14 = vpop.f32.mrb[3].mxu0  ;;  %5420 = vpow2.f32 %v4166_v22  ;;  %v5181_v34 = vadd.f32 %v4871_v13, %v6593_v26  ;;  %v335_v13 = vadd.f32 %v6503_v60, %v6572_v3 }
 0x149   :  { %5422 = vpow2.f32 %v4165_v25  ;;  %v5182_v37 = vadd.f32 %v1480_v14, %v6597_v30  ;;  %v330_v14 = vadd.f32 %v6507_v61, %v6568_v1  ;;  %v6617_v61 = vpop.permute.xlu1 %157 }
 0x14a   :  { %v4168_v12 = vmul.f32 -1.442695, %v5181_v34 }
 0x14b   :  { %v4874_v19 = vpop.f32.mrb[4].mxu0  ;;  %v4167_v58 = vmul.f32 -1.442695, %v5182_v37 }
 0x14c   :  { %v5183_v20 = vadd.f32 %v4874_v19, %v6580_v8  ;;  %v1490_v21 = vpop.f32.mrb[5].mxu0 }
 0x14d   :  { %v5184_v23 = vadd.f32 %v1490_v21, %v6582_v11 }
 0x14e   :  { %v4170_v28 = vmul.f32 -1.442695, %v5183_v20 }
 0x14f   :  { %v4877_v29 = vpop.f32.mrb[54].mxu0  ;;  %v4169_v31 = vmul.f32 -1.442695, %v5184_v23 }
 0x150   :  { %v1556_v32 = vadd.f32 %v4877_v29, %v315_v24  ;;  %v1500_v33 = vpop.f32.mrb[55].mxu0  ;;  %5424 = vpow2.f32 %v4170_v28  ;;  %v345_v28 = vadd.f32 %v6511_v62, %v6605_v10 }
 0x151   :  { %v1555_v35 = vadd.f32 %v1500_v33, %v310_v27  ;;  %5426 = vpow2.f32 %v4169_v31  ;;  %v340_v33 = vadd.f32 %v6515_v63, %v6609_v18  ;;  %v355_v63 = vadd.f32 %v6519_v0, %v6617_v61 }
 0x152   :  { %5428 = vpow2.f32 %v4168_v12  ;;  %v4172_v24 = vmul.f32 -1.442695, %v1556_v32  ;;  %v5421_v31 = vpop.eup %5420 }
 0x153   :  { %v4880_v56 = vpop.f32.mrb[56].mxu0  ;;  %5430 = vpow2.f32 %v4167_v58  ;;  %v4171_v60 = vmul.f32 -1.442695, %v1555_v35  ;;  %v5423_v37 = vpop.eup %5422 }
 0x154   :  { %v1558_v57 = vadd.f32 %v4880_v56, %v325_v36  ;;  %v1510_v9 = vpop.f32.mrb[57].mxu0 }
 0x155   :  { %v1557_v16 = vadd.f32 %v1510_v9, %v320_v55  ;;  %v6619_v55 = vpop.permute.xlu0 %152 }
 0x156   :  { %v4162_v19 = vmul.f32 -2.0, %v1558_v57  ;;  %v350_v58 = vadd.f32 %v6523_v4, %v6619_v55 }
 0x157   :  { %v4161_v59 = vmul.f32 -2.0, %v1557_v16  ;;  %v4883_v20 = vpop.f32.mrb[58].mxu0  ;;  %v1630_v16 = vadd.f32 1.0, %v5421_v31 }
 0x158   :  { %v1615_v21 = vmul.f32 1.442695, %v4162_v19  ;;  %v1560_v22 = vadd.f32 %v4883_v20, %v335_v13  ;;  %v1520_v23 = vpop.f32.mrb[59].mxu0  ;;  %v1629_v13 = vadd.f32 1.0, %v5423_v37 }
 0x159   :  { %v1613_v25 = vmul.f32 1.442695, %v4161_v59  ;;  %v1559_v27 = vadd.f32 %v1520_v23, %v330_v14 }
 0x15a   :  { %v4164_v29 = vmul.f32 -2.0, %v1560_v22  ;;  %5432 = vpow2.f32 %v1615_v21  ;;  %v5425_v62 = vpop.eup %5424 }
 0x15b   :  { %v4163_v34 = vmul.f32 -2.0, %v1559_v27  ;;  %v4886_v36 = vpop.f32.mrb[60].mxu0  ;;  %5434 = vpow2.f32 %v1613_v25  ;;  %v5427_v12 = vpop.eup %5426  ;;  %v1634_v14 = vadd.f32 1.0, %v5425_v62 }
 0x15c   :  { %v1619_v32 = vmul.f32 1.442695, %v4164_v29  ;;  %v1562_v56 = vadd.f32 %v4886_v36, %v345_v28  ;;  %v1530_v57 = vpop.f32.mrb[61].mxu0  ;;  %5436 = vpow2.f32 %v4172_v24  ;;  %v1633_v21 = vadd.f32 1.0, %v5427_v12  ;;  %v5429_v24 = vpop.eup %5428 }
 0x15d   :  { %v1617_v35 = vmul.f32 1.442695, %v4163_v34  ;;  %v1561_v9 = vadd.f32 %v1530_v57, %v340_v33  ;;  %5438 = vpow2.f32 %v4171_v60  ;;  %v5431_v27 = vpop.eup %5430 }
 0x15e   :  { %5440 = vpow2.f32 %v1619_v32  ;;  %v4174_v23 = vmul.f32 -1.442695, %v1562_v56 }
 0x15f   :  { %v4889_v19 = vpop.f32.mrb[62].mxu0  ;;  %5442 = vpow2.f32 %v1617_v35  ;;  %v4173_v25 = vmul.f32 -1.442695, %v1561_v9  ;;  %v1632_v9 = vadd.f32 1.0, %v5429_v24 }
 0x160   :  { %v1564_v59 = vadd.f32 %v4889_v19, %v355_v63  ;;  %v1540_v20 = vpop.f32.mrb[63].mxu0  ;;  %5444 = vrcp.f32 %v1630_v16  ;;  %v1631_v16 = vadd.f32 1.0, %v5431_v27 }
 0x161   :  { %v1563_v22 = vadd.f32 %v1540_v20, %v350_v58  ;;  %5446 = vrcp.f32 %v1629_v13 }
 0x162   :  { %5448 = vrcp.f32 %v1634_v14  ;;  %v4176_v4 = vmul.f32 -1.442695, %v1564_v59 }
 0x163   :  { %5450 = vrcp.f32 %v1633_v21  ;;  %v4175_v33 = vmul.f32 -1.442695, %v1563_v22 }
 0x164   :  { %v5433_v0 = vpop.eup %5432  ;;  %5452 = vpow2.f32 %v4174_v23 }
 0x165   :  { %v5435_v28 = vpop.eup %5434  ;;  %v1638_v60 = vadd.f32 1.0, %v5433_v0  ;;  %5454 = vpow2.f32 %v4173_v25 }
 0x166   :  { %v5437_v29 = vpop.eup %5436  ;;  %v1637_v31 = vadd.f32 1.0, %v5435_v28 }
 0x167   :  { %v5439_v34 = vpop.eup %5438  ;;  %5456 = vrcp.f32 %v1638_v60  ;;  %v1636_v32 = vadd.f32 1.0, %v5437_v29 }
 0x168   :  { %v5441_v36 = vpop.eup %5440  ;;  %5458 = vrcp.f32 %v1637_v31  ;;  %v1635_v57 = vadd.f32 1.0, %v5439_v34 }
 0x169   :  { %v5443_v37 = vpop.eup %5442  ;;  %v1640_v56 = vadd.f32 1.0, %v5441_v36  ;;  %5460 = vpow2.f32 %v4176_v4 }
 0x16a   :  { %v1639_v62 = vadd.f32 1.0, %v5443_v37  ;;  %5462 = vpow2.f32 %v4175_v33  ;;  %v5445_v35 = vpop.eup %5444 }
 0x16b   :  { %5464 = vrcp.f32 %v1640_v56  ;;  %v5447_v12 = vpop.eup %5446 }
 0x16c   :  { %5466 = vrcp.f32 %v1639_v62  ;;  %v5449_v63 = vpop.eup %5448 }
 0x16d   :  { %5468 = vrcp.f32 %v1636_v32  ;;  %v5451_v13 = vpop.eup %5450  ;;  %v1710_v4 = vmul.f32 0.0, %v5449_v63 }
 0x16e   :  { %5470 = vrcp.f32 %v1635_v57  ;;  %v5453_v58 = vpop.eup %5452  ;;  %v1709_v34 = vmul.f32 0.0, %v5451_v13 }
 0x16f   :  { %5472 = vrcp.f32 %v1632_v9  ;;  %v5455_v19 = vpop.eup %5454  ;;  %v1642_v24 = vadd.f32 1.0, %v5453_v58 }
 0x170   :  { %5474 = vrcp.f32 %v1631_v16  ;;  %v1641_v27 = vadd.f32 1.0, %v5455_v19 }
 0x171   :  { %v5457_v14 = vpop.eup %5456  ;;  %5476 = vrcp.f32 %v1642_v24 }
 0x172   :  { %v5459_v59 = vpop.eup %5458  ;;  %v1686_v20 = vmul.f32 2.0, %v5457_v14  ;;  %5478 = vrcp.f32 %v1641_v27 }
 0x173   :  { %v5461_v21 = vpop.eup %5460  ;;  %v1685_v22 = vmul.f32 2.0, %v5459_v59 }
 0x174   :  { %v5463_v23 = vpop.eup %5462  ;;  %v4178_v25 = vadd.f32 -1.0, %v1686_v20  ;;  %v1644_v62 = vadd.f32 1.0, %v5461_v21 }
 0x175   :  { %v5465_v0 = vpop.eup %5464  ;;  %v4177_v28 = vadd.f32 -1.0, %v1685_v22  ;;  %v1643_v19 = vadd.f32 1.0, %v5463_v23 }
 0x176   :  { %v5467_v60 = vpop.eup %5466  ;;  %v1714_v29 = vmul.f32 %v5445_v35, %v4178_v25  ;;  %v1688_v31 = vmul.f32 2.0, %v5465_v0 }
 0x177   :  { %v5469_v33 = vpop.eup %5468  ;;  %v1713_v36 = vmul.f32 %v5447_v12, %v4177_v28  ;;  %v1687_v37 = vmul.f32 2.0, %v5467_v60 }
 0x178   :  { %v5471_v32 = vpop.eup %5470  ;;  %v6625_v56 = vadd.f32 %v1714_v29, %v1710_v4  ;;  %v4180_v57 = vadd.f32 -1.0, %v1688_v31  ;;  %v1712_v63 = vmul.f32 0.0, %v5469_v33 }
 0x179   :  { %v5473_v9 = vpop.eup %5472  ;;  %v6627_v16 = vadd.f32 %v1713_v36, %v1709_v34  ;;  %v4179_v58 = vadd.f32 -1.0, %v1687_v37  ;;  %v1711_v13 = vmul.f32 0.0, %v5471_v32 }
 0x17a   :  { %v5475_v14 = vpop.eup %5474  ;;  %5480 = vtanh.f32 %v6625_v56  ;;  %v1716_v35 = vmul.f32 %v5473_v9, %v4180_v57 }
 0x17b   :  { %5482 = vtanh.f32 %v6627_v16  ;;  %v1715_v12 = vmul.f32 %v5475_v14, %v4179_v58  ;;  %v5477_v21 = vpop.eup %5476 }
 0x17c   :  { %v6631_v59 = vadd.f32 %v1716_v35, %v1712_v63  ;;  %5484 = vrcp.f32 %v1644_v62  ;;  %v5479_v22 = vpop.eup %5478 }
 0x17d   :  { %v6633_v20 = vadd.f32 %v1715_v12, %v1711_v13  ;;  %5486 = vrcp.f32 %v1643_v19 }
 0x17e   :  { %5488 = vtanh.f32 %v6631_v59 }
 0x17f   :  { %5490 = vtanh.f32 %v6633_v20 }
 0x184   :  { %v5481_v23 = vpop.eup %5480 }
 0x185   :  { %v5483_v25 = vpop.eup %5482  ;;  %v1726_v24 = vmul.f32 %v5481_v23, %v5477_v21 }
 0x186   :  { %v5485_v0 = vpop.eup %5484  ;;  %v1725_v28 = vmul.f32 %v5483_v25, %v5479_v22 }
 0x187   :  { %v5487_v27 = vpop.eup %5486 }
 0x188   :  { %v5489_v60 = vpop.eup %5488  ;;  %v5115_v4 = vpack.c.bf16 %v1726_v24, %v1725_v28 }
 0x189   :  { %v5491_v29 = vpop.eup %5490  ;;  %v1728_v31 = vmul.f32 %v5489_v60, %v5485_v0 }
 0x18a   :  { %5116 = vmatprep.subr.bf16.mxu1 %v5115_v4  ;;  %v1727_v33 = vmul.f32 %v5491_v29, %v5487_v27 }
 0x18b   :  { %5118 = vmatpush3.bf16.msra.mxu1 %v5115_v4 }
 0x18c   :  { %v5119_v34 = vpack.c.bf16 %v1728_v31, %v1727_v33 }
 0x18e   :  { %5120 = vmatprep.subr.bf16.mxu1 %v5119_v34 }
 0x18f   :  { %5122 = vmatpush3.bf16.msra.mxu1 %v5119_v34 }
 0x192   :  { %4899 = vmatmul.mubr.msk.f32.vlgmr.msra.gmra.mrb[10].mxu1 %vm1355_vm2, %v6372_v40 }
 0x193   :  { %4901 = vmatprep.mubr.msk.f32.mxu1 %vm1355_vm2, %v6377_v41 }
 0x196   :  { %4902 = vmatmul.mubr.msk.f32.gmra.mrb[12].mxu1 %vm1355_vm2, %v6386_v42 }
 0x197   :  { %4904 = vmatprep.mubr.msk.f32.mxu1 %vm1355_vm2, %v6391_v43 }
 0x19a   :  { %4905 = vmatmul.mubr.msk.f32.gmra.mrb[14].mxu1 %vm1355_vm2, %v6400_v44 }
 0x19b   :  { %4907 = vmatprep.mubr.msk.f32.mxu1 %vm1355_vm2, %v6405_v45 }
 0x19e   :  { %4908 = vmatmul.mubr.msk.f32.gmra.mrb[16].mxu1 %vm1355_vm2, %v6414_v46 }
 0x19f   :  { %4910 = vmatprep.mubr.msk.f32.mxu1 %vm1355_vm2, %v6419_v47 }
 0x1a2   :  { %4911 = vmatmul.mubr.msk.f32.gmra.mrb[18].mxu1 %vm1355_vm2, %v6428_v48 }
 0x1a3   :  { %4913 = vmatprep.mubr.msk.f32.mxu1 %vm1355_vm2, %v6433_v49 }
 0x1a6   :  { %4914 = vmatmul.mubr.msk.f32.gmra.mrb[20].mxu1 %vm1355_vm2, %v6442_v50 }
 0x1a7   :  { %4916 = vmatprep.mubr.msk.f32.mxu1 %vm1355_vm2, %v6447_v51 }
 0x1aa   :  { %4917 = vmatmul.mubr.msk.f32.gmra.mrb[22].mxu1 %vm1355_vm2, %v6456_v52 }
 0x1ab   :  { %4919 = vmatprep.mubr.msk.f32.mxu1 %vm1355_vm2, %v6461_v53 }
 0x1ae   :  { %4920 = vmatmul.mubr.msk.f32.gmra.mrb[24].mxu1 %vm1355_vm2, %v6470_v54 }
 0x1af   :  { %4962 = vmatprep.mubr.msk.f32.mxu1 %vm1355_vm2, %v6363_v39 }
 0x265   :  { %v4900_v36 = vpop.f32.mrb[10].mxu1 }
 0x266   :  { %v1795_v37 = vpop.f32.mrb[11].mxu1  ;;  %v5205_v62 = vadd.f32 %v4900_v36, %v6576_v6 }
 0x267   :  { %v5206_v9 = vadd.f32 %v1795_v37, %v6578_v7 }
 0x268   :  { %v4202_v63 = vmul.f32 -1.442695, %v5205_v62 }
 0x269   :  { %v4903_v32 = vpop.f32.mrb[12].mxu1  ;;  %v4201_v13 = vmul.f32 -1.442695, %v5206_v9 }
 0x26a   :  { %v1805_v57 = vpop.f32.mrb[13].mxu1  ;;  %5492 = vpow2.f32 %v4202_v63  ;;  %v5207_v25 = vadd.f32 %v4903_v32, %v6593_v26 }
 0x26b   :  { %5494 = vpow2.f32 %v4201_v13  ;;  %v5208_v24 = vadd.f32 %v1805_v57, %v6597_v30 }
 0x26c   :  { %v4204_v60 = vmul.f32 -1.442695, %v5207_v25 }
 0x26d   :  { %v4906_v58 = vpop.f32.mrb[14].mxu1  ;;  %v4203_v31 = vmul.f32 -1.442695, %v5208_v24 }
 0x26e   :  { %v5209_v19 = vadd.f32 %v4906_v58, %v6580_v8  ;;  %v1815_v14 = vpop.f32.mrb[15].mxu1 }
 0x26f   :  { %v5210_v35 = vadd.f32 %v1815_v14, %v6582_v11 }
 0x270   :  { %v4206_v12 = vmul.f32 -1.442695, %v5209_v19 }
 0x271   :  { %v4909_v21 = vpop.f32.mrb[16].mxu1  ;;  %v4205_v22 = vmul.f32 -1.442695, %v5210_v35 }
 0x272   :  { %v1825_v23 = vpop.f32.mrb[17].mxu1  ;;  %5496 = vpow2.f32 %v4206_v12  ;;  %v5211_v4 = vadd.f32 %v4909_v21, %v6584_v15 }
 0x273   :  { %5498 = vpow2.f32 %v4205_v22  ;;  %v5212_v33 = vadd.f32 %v1825_v23, %v6587_v17 }
 0x274   :  { %5500 = vpow2.f32 %v4204_v60  ;;  %v4208_v9 = vmul.f32 -1.442695, %v5211_v4  ;;  %v5493_v35 = vpop.eup %5492 }
 0x275   :  { %v4912_v0 = vpop.f32.mrb[18].mxu1  ;;  %5502 = vpow2.f32 %v4203_v31  ;;  %v4207_v14 = vmul.f32 -1.442695, %v5212_v33  ;;  %v5495_v21 = vpop.eup %5494 }
 0x276   :  { %v5213_v28 = vadd.f32 %v4912_v0, %v6574_v5  ;;  %v1835_v27 = vpop.f32.mrb[19].mxu1  ;;  %v1954_v60 = vadd.f32 1.0, %v5495_v21 }
 0x277   :  { %v5214_v29 = vadd.f32 %v1835_v27, %v6570_v2 }
 0x278   :  { %v4198_v34 = vmul.f32 -2.0, %v5213_v28  ;;  %v1955_v28 = vadd.f32 1.0, %v5493_v35 }
 0x279   :  { %v4197_v36 = vmul.f32 -2.0, %v5214_v29  ;;  %v4915_v37 = vpop.f32.mrb[20].mxu1 }
 0x27a   :  { %v1940_v32 = vmul.f32 1.442695, %v4198_v34  ;;  %v5215_v57 = vadd.f32 %v4915_v37, %v6572_v3  ;;  %v1845_v62 = vpop.f32.mrb[21].mxu1 }
 0x27b   :  { %v1938_v58 = vmul.f32 1.442695, %v4197_v36  ;;  %v5216_v19 = vadd.f32 %v1845_v62, %v6568_v1 }
 0x27c   :  { %v4200_v63 = vmul.f32 -2.0, %v5215_v57  ;;  %5504 = vpow2.f32 %v1940_v32  ;;  %v5497_v25 = vpop.eup %5496 }
 0x27d   :  { %v4199_v13 = vmul.f32 -2.0, %v5216_v19  ;;  %v4918_v12 = vpop.f32.mrb[22].mxu1  ;;  %5506 = vpow2.f32 %v1938_v58  ;;  %v5499_v0 = vpop.eup %5498  ;;  %v1959_v31 = vadd.f32 1.0, %v5497_v25 }
 0x27e   :  { %v1944_v22 = vmul.f32 1.442695, %v4200_v63  ;;  %v1855_v23 = vpop.f32.mrb[23].mxu1  ;;  %5508 = vpow2.f32 %v4208_v9  ;;  %v5217_v27 = vadd.f32 %v4918_v12, %v6605_v10  ;;  %v1958_v34 = vadd.f32 1.0, %v5499_v0  ;;  %v5501_v32 = vpop.eup %5500 }
 0x27f   :  { %v1942_v24 = vmul.f32 1.442695, %v4199_v13  ;;  %5510 = vpow2.f32 %v4207_v14  ;;  %v5218_v4 = vadd.f32 %v1855_v23, %v6609_v18  ;;  %v5503_v9 = vpop.eup %5502 }
 0x280   :  { %5512 = vpow2.f32 %v1944_v22  ;;  %v4210_v36 = vmul.f32 -1.442695, %v5217_v27 }
 0x281   :  { %v4921_v29 = vpop.f32.mrb[24].mxu1  ;;  %5514 = vpow2.f32 %v1942_v24  ;;  %v4209_v57 = vmul.f32 -1.442695, %v5218_v4 }
 0x282   :  { %v1865_v33 = vpop.f32.mrb[25].mxu1  ;;  %5516 = vrcp.f32 %v1955_v28  ;;  %v5219_v37 = vadd.f32 %v4921_v29, %v6617_v61  ;;  %v1956_v29 = vadd.f32 1.0, %v5503_v9 }
 0x283   :  { %5518 = vrcp.f32 %v1954_v60  ;;  %v5220_v62 = vadd.f32 %v1865_v33, %v6619_v55  ;;  %v1957_v60 = vadd.f32 1.0, %v5501_v32 }
 0x284   :  { %5520 = vrcp.f32 %v1959_v31  ;;  %v4212_v63 = vmul.f32 -1.442695, %v5219_v37 }
 0x285   :  { %5522 = vrcp.f32 %v1958_v34  ;;  %v4211_v12 = vmul.f32 -1.442695, %v5220_v62 }
 0x286   :  { %v5505_v58 = vpop.eup %5504  ;;  %5524 = vpow2.f32 %v4210_v36 }
 0x287   :  { %v5507_v19 = vpop.eup %5506  ;;  %v1963_v14 = vadd.f32 1.0, %v5505_v58  ;;  %5526 = vpow2.f32 %v4209_v57 }
 0x288   :  { %v5509_v35 = vpop.eup %5508  ;;  %v1962_v13 = vadd.f32 1.0, %v5507_v19 }
 0x289   :  { %v5511_v21 = vpop.eup %5510  ;;  %5528 = vrcp.f32 %v1963_v14  ;;  %v1961_v25 = vadd.f32 1.0, %v5509_v35 }
 0x28a   :  { %v5513_v22 = vpop.eup %5512  ;;  %5530 = vrcp.f32 %v1962_v13  ;;  %v1960_v0 = vadd.f32 1.0, %v5511_v21 }
 0x28b   :  { %v5515_v23 = vpop.eup %5514  ;;  %v1965_v24 = vadd.f32 1.0, %v5513_v22  ;;  %5532 = vpow2.f32 %v4212_v63 }
 0x28c   :  { %v1964_v28 = vadd.f32 1.0, %v5515_v23  ;;  %5534 = vpow2.f32 %v4211_v12  ;;  %v5517_v27 = vpop.eup %5516 }
 0x28d   :  { %5536 = vrcp.f32 %v1965_v24  ;;  %v5519_v4 = vpop.eup %5518 }
 0x28e   :  { %5538 = vrcp.f32 %v1964_v28  ;;  %v5521_v31 = vpop.eup %5520 }
 0x28f   :  { %5540 = vrcp.f32 %v1961_v25  ;;  %v5523_v33 = vpop.eup %5522  ;;  %v2035_v21 = vmul.f32 %v5521_v31, %v6625_v56 }
 0x290   :  { %5542 = vrcp.f32 %v1960_v0  ;;  %v5525_v34 = vpop.eup %5524  ;;  %v2034_v24 = vmul.f32 %v5523_v33, %v6627_v16 }
 0x291   :  { %5544 = vrcp.f32 %v1957_v60  ;;  %v5527_v36 = vpop.eup %5526  ;;  %v1967_v32 = vadd.f32 1.0, %v5525_v34 }
 0x292   :  { %5546 = vrcp.f32 %v1956_v29  ;;  %v1966_v9 = vadd.f32 1.0, %v5527_v36 }
 0x293   :  { %v5529_v37 = vpop.eup %5528  ;;  %5548 = vrcp.f32 %v1967_v32 }
 0x294   :  { %v5531_v57 = vpop.eup %5530  ;;  %v2011_v62 = vmul.f32 2.0, %v5529_v37  ;;  %5550 = vrcp.f32 %v1966_v9 }
 0x295   :  { %v5533_v58 = vpop.eup %5532  ;;  %v2010_v19 = vmul.f32 2.0, %v5531_v57 }
 0x296   :  { %v5535_v14 = vpop.eup %5534  ;;  %v4214_v63 = vadd.f32 -1.0, %v2011_v62  ;;  %v1969_v57 = vadd.f32 1.0, %v5533_v58 }
 0x297   :  { %v5537_v35 = vpop.eup %5536  ;;  %v4213_v13 = vadd.f32 -1.0, %v2010_v19  ;;  %v1968_v19 = vadd.f32 1.0, %v5535_v14 }
 0x298   :  { %v5539_v12 = vpop.eup %5538  ;;  %v2039_v22 = vmul.f32 %v5517_v27, %v4214_v63  ;;  %v2013_v23 = vmul.f32 2.0, %v5537_v35 }
 0x299   :  { %v5541_v25 = vpop.eup %5540  ;;  %v2038_v0 = vmul.f32 %v5519_v4, %v4213_v13  ;;  %v2012_v28 = vmul.f32 2.0, %v5539_v12 }
 0x29a   :  { %v5543_v60 = vpop.eup %5542  ;;  %v6687_v29 = vadd.f32 %v2039_v22, %v2035_v21  ;;  %v4216_v37 = vadd.f32 -1.0, %v2013_v23  ;;  %v2037_v27 = vmul.f32 %v5541_v25, %v6631_v59 }
 0x29b   :  { %v5545_v34 = vpop.eup %5544  ;;  %v6689_v62 = vadd.f32 %v2038_v0, %v2034_v24  ;;  %v4215_v36 = vadd.f32 -1.0, %v2012_v28  ;;  %v2036_v4 = vmul.f32 %v5543_v60, %v6633_v20 }
 0x29c   :  { %v5547_v56 = vpop.eup %5546  ;;  %5552 = vtanh.f32 %v6687_v29  ;;  %v2041_v16 = vmul.f32 %v5545_v34, %v4216_v37 }
 0x29d   :  { %5554 = vtanh.f32 %v6689_v62  ;;  %v2040_v31 = vmul.f32 %v5547_v56, %v4215_v36  ;;  %v5549_v14 = vpop.eup %5548 }
 0x29e   :  { %v6695_v33 = vadd.f32 %v2041_v16, %v2037_v27  ;;  %5556 = vrcp.f32 %v1969_v57  ;;  %v5551_v63 = vpop.eup %5550 }
 0x29f   :  { %v6697_v58 = vadd.f32 %v2040_v31, %v2036_v4  ;;  %5558 = vrcp.f32 %v1968_v19 }
 0x2a0   :  { %5560 = vtanh.f32 %v6695_v33 }
 0x2a1   :  { %5562 = vtanh.f32 %v6697_v58 }
 0x2a6   :  { %v5553_v32 = vpop.eup %5552 }
 0x2a7   :  { %v5555_v59 = vpop.eup %5554  ;;  %v2051_v35 = vmul.f32 %v5553_v32, %v5549_v14 }
 0x2a8   :  { %v5557_v13 = vpop.eup %5556  ;;  %v2050_v9 = vmul.f32 %v5555_v59, %v5551_v63 }
 0x2a9   :  { %v5559_v12 = vpop.eup %5558 }
 0x2aa   :  { %v5561_v20 = vpop.eup %5560  ;;  %v5123_v21 = vpack.c.bf16 %v2051_v35, %v2050_v9 }
 0x2ab   :  { %v5563_v22 = vpop.eup %5562  ;;  %v2053_v23 = vmul.f32 %v5561_v20, %v5557_v13 }
 0x2ac   :  { %5124 = vmatprep.subr.bf16.mxu0 %v5123_v21  ;;  %v2052_v25 = vmul.f32 %v5563_v22, %v5559_v12 }
 0x2ad   :  { %5126 = vmatpush3.bf16.msra.mxu0 %v5123_v21 }
 0x2ae   :  { %v5127_v24 = vpack.c.bf16 %v2053_v23, %v2052_v25 }
 0x2b0   :  { %5128 = vmatprep.subr.bf16.mxu0 %v5127_v24 }
 0x2b1   :  { %5130 = vmatpush3.bf16.msra.mxu0 %v5127_v24 }
 0x2b4   :  { %4931 = vmatmul.mubr.msk.f32.vlgmr.msra.gmra.mrb[6].mxu0 %vm1355_vm2, %v6372_v40 }
 0x2b5   :  { %4933 = vmatprep.mubr.msk.f32.mxu0 %vm1355_vm2, %v6377_v41 }
 0x2b8   :  { %4934 = vmatmul.mubr.msk.f32.gmra.mrb[8].mxu0 %vm1355_vm2, %v6386_v42 }
 0x2b9   :  { %4936 = vmatprep.mubr.msk.f32.mxu0 %vm1355_vm2, %v6391_v43 }
 0x2bc   :  { %4937 = vmatmul.mubr.msk.f32.gmra.mrb[10].mxu0 %vm1355_vm2, %v6400_v44 }
 0x2bd   :  { %4939 = vmatprep.mubr.msk.f32.mxu0 %vm1355_vm2, %v6405_v45 }
 0x2c0   :  { %4940 = vmatmul.mubr.msk.f32.gmra.mrb[12].mxu0 %vm1355_vm2, %v6414_v46 }
 0x2c1   :  { %4942 = vmatprep.mubr.msk.f32.mxu0 %vm1355_vm2, %v6419_v47 }
 0x2c4   :  { %4943 = vmatmul.mubr.msk.f32.gmra.mrb[14].mxu0 %vm1355_vm2, %v6428_v48 }
 0x2c5   :  { %4945 = vmatprep.mubr.msk.f32.mxu0 %vm1355_vm2, %v6433_v49 }
 0x2c8   :  { %4946 = vmatmul.mubr.msk.f32.gmra.mrb[16].mxu0 %vm1355_vm2, %v6442_v50 }
 0x2c9   :  { %4948 = vmatprep.mubr.msk.f32.mxu0 %vm1355_vm2, %v6447_v51 }
 0x2cc   :  { %4949 = vmatmul.mubr.msk.f32.gmra.mrb[18].mxu0 %vm1355_vm2, %v6456_v52 }
 0x2cd   :  { %4951 = vmatprep.mubr.msk.f32.mxu0 %vm1355_vm2, %v6461_v53 }
 0x2d0   :  { %4952 = vmatmul.mubr.msk.f32.gmra.mrb[20].mxu0 %vm1355_vm2, %v6470_v54 }
 0x2d1   :  { %4994 = vmatprep.mubr.msk.f32.mxu0 %vm1355_vm2, %v6363_v39 }
 0x387   :  { %v4932_v40 = vpop.f32.mrb[6].mxu0 }
 0x388   :  { %v2120_v41 = vpop.f32.mrb[7].mxu0  ;;  %v5221_v44 = vadd.f32 %v4932_v40, %v6576_v6 }
 0x389   :  { %v5222_v45 = vadd.f32 %v2120_v41, %v6578_v7 }
 0x38a   :  { %v4238_v49 = vmul.f32 -1.442695, %v5221_v44 }
 0x38b   :  { %v4935_v42 = vpop.f32.mrb[8].mxu0  ;;  %v4237_v51 = vmul.f32 -1.442695, %v5222_v45 }
 0x38c   :  { %v2130_v43 = vpop.f32.mrb[9].mxu0  ;;  %5564 = vpow2.f32 %v4238_v49  ;;  %v5223_v0 = vadd.f32 %v4935_v42, %v6593_v26 }
 0x38d   :  { %5566 = vpow2.f32 %v4237_v51  ;;  %v5224_v28 = vadd.f32 %v2130_v43, %v6597_v30 }
 0x38e   :  { %v4240_v34 = vmul.f32 -1.442695, %v5223_v0 }
 0x38f   :  { %v4938_v46 = vpop.f32.mrb[10].mxu0  ;;  %v4239_v56 = vmul.f32 -1.442695, %v5224_v28 }
 0x390   :  { %v5225_v47 = vadd.f32 %v4938_v46, %v6580_v8  ;;  %v2140_v48 = vpop.f32.mrb[11].mxu0 }
 0x391   :  { %v5226_v50 = vadd.f32 %v2140_v48, %v6582_v11 }
 0x392   :  { %v4242_v52 = vmul.f32 -1.442695, %v5225_v47 }
 0x393   :  { %v4941_v53 = vpop.f32.mrb[12].mxu0  ;;  %v4241_v54 = vmul.f32 -1.442695, %v5226_v50 }
 0x394   :  { %v2150_v39 = vpop.f32.mrb[13].mxu0  ;;  %5568 = vpow2.f32 %v4242_v52  ;;  %v5227_v36 = vadd.f32 %v4941_v53, %v6584_v15 }
 0x395   :  { %5570 = vpow2.f32 %v4241_v54  ;;  %v5228_v27 = vadd.f32 %v2150_v39, %v6587_v17 }
 0x396   :  { %5572 = vpow2.f32 %v4240_v34  ;;  %v4244_v59 = vmul.f32 -1.442695, %v5227_v36  ;;  %v5565_v20 = vpop.eup %5564 }
 0x397   :  { %v4944_v60 = vpop.f32.mrb[14].mxu0  ;;  %5574 = vpow2.f32 %v4239_v56  ;;  %v4243_v9 = vmul.f32 -1.442695, %v5228_v27  ;;  %v5567_v23 = vpop.eup %5566  ;;  %v2280_v43 = vadd.f32 1.0, %v5565_v20 }
 0x398   :  { %v5229_v37 = vadd.f32 %v4944_v60, %v6574_v5  ;;  %v2160_v57 = vpop.f32.mrb[15].mxu0  ;;  %v2279_v45 = vadd.f32 1.0, %v5567_v23 }
 0x399   :  { %v5230_v19 = vadd.f32 %v2160_v57, %v6570_v2 }
 0x39a   :  { %v4234_v16 = vmul.f32 -2.0, %v5229_v37 }
 0x39b   :  { %v4233_v4 = vmul.f32 -2.0, %v5230_v19  ;;  %v4947_v31 = vpop.f32.mrb[16].mxu0 }
 0x39c   :  { %v2265_v14 = vmul.f32 1.442695, %v4234_v16  ;;  %v5231_v63 = vadd.f32 %v4947_v31, %v6572_v3  ;;  %v2170_v32 = vpop.f32.mrb[17].mxu0 }
 0x39d   :  { %v2263_v35 = vmul.f32 1.442695, %v4233_v4  ;;  %v5232_v13 = vadd.f32 %v2170_v32, %v6568_v1 }
 0x39e   :  { %v4236_v12 = vmul.f32 -2.0, %v5231_v63  ;;  %5576 = vpow2.f32 %v2265_v14  ;;  %v5569_v40 = vpop.eup %5568 }
 0x39f   :  { %v4235_v21 = vmul.f32 -2.0, %v5232_v13  ;;  %v4950_v22 = vpop.f32.mrb[18].mxu0  ;;  %5578 = vpow2.f32 %v2263_v35  ;;  %v5571_v42 = vpop.eup %5570  ;;  %v2284_v48 = vadd.f32 1.0, %v5569_v40 }
 0x3a0   :  { %v2269_v25 = vmul.f32 1.442695, %v4236_v12  ;;  %v2180_v24 = vpop.f32.mrb[19].mxu0  ;;  %5580 = vpow2.f32 %v4244_v59  ;;  %v5233_v44 = vadd.f32 %v4950_v22, %v6605_v10  ;;  %v2283_v50 = vadd.f32 1.0, %v5571_v42  ;;  %v5573_v53 = vpop.eup %5572 }
 0x3a1   :  { %v2267_v41 = vmul.f32 1.442695, %v4235_v21  ;;  %5582 = vpow2.f32 %v4243_v9  ;;  %v5234_v46 = vadd.f32 %v2180_v24, %v6609_v18  ;;  %v5575_v0 = vpop.eup %5574  ;;  %v2282_v59 = vadd.f32 1.0, %v5573_v53 }
 0x3a2   :  { %5584 = vpow2.f32 %v2269_v25  ;;  %v4246_v51 = vmul.f32 -1.442695, %v5233_v44  ;;  %v2281_v13 = vadd.f32 1.0, %v5575_v0 }
 0x3a3   :  { %v4953_v47 = vpop.f32.mrb[20].mxu0  ;;  %5586 = vpow2.f32 %v2267_v41  ;;  %v4245_v54 = vmul.f32 -1.442695, %v5234_v46 }
 0x3a4   :  { %v2190_v49 = vpop.f32.mrb[21].mxu0  ;;  %5588 = vrcp.f32 %v2280_v43  ;;  %v5235_v52 = vadd.f32 %v4953_v47, %v6617_v61 }
 0x3a5   :  { %5590 = vrcp.f32 %v2279_v45  ;;  %v5236_v39 = vadd.f32 %v2190_v49, %v6619_v55 }
 0x3a6   :  { %5592 = vrcp.f32 %v2284_v48  ;;  %v4248_v57 = vmul.f32 -1.442695, %v5235_v52 }
 0x3a7   :  { %5594 = vrcp.f32 %v2283_v50  ;;  %v4247_v19 = vmul.f32 -1.442695, %v5236_v39 }
 0x3a8   :  { %v5577_v28 = vpop.eup %5576  ;;  %5596 = vpow2.f32 %v4246_v51 }
 0x3a9   :  { %v5579_v60 = vpop.eup %5578  ;;  %v2288_v37 = vadd.f32 1.0, %v5577_v28  ;;  %5598 = vpow2.f32 %v4245_v54 }
 0x3aa   :  { %v5581_v34 = vpop.eup %5580  ;;  %v2287_v36 = vadd.f32 1.0, %v5579_v60 }
 0x3ab   :  { %v5583_v56 = vpop.eup %5582  ;;  %5600 = vrcp.f32 %v2288_v37  ;;  %v2286_v4 = vadd.f32 1.0, %v5581_v34 }
 0x3ac   :  { %v5585_v27 = vpop.eup %5584  ;;  %5602 = vrcp.f32 %v2287_v36  ;;  %v2285_v14 = vadd.f32 1.0, %v5583_v56 }
 0x3ad   :  { %v5587_v16 = vpop.eup %5586  ;;  %v2290_v31 = vadd.f32 1.0, %v5585_v27  ;;  %5604 = vpow2.f32 %v4248_v57 }
 0x3ae   :  { %v2289_v63 = vadd.f32 1.0, %v5587_v16  ;;  %5606 = vpow2.f32 %v4247_v19  ;;  %v5589_v32 = vpop.eup %5588 }
 0x3af   :  { %5608 = vrcp.f32 %v2290_v31  ;;  %v5591_v35 = vpop.eup %5590 }
 0x3b0   :  { %5610 = vrcp.f32 %v2289_v63  ;;  %v5593_v9 = vpop.eup %5592 }
 0x3b1   :  { %5612 = vrcp.f32 %v2286_v4  ;;  %v5595_v12 = vpop.eup %5594  ;;  %v2360_v48 = vmul.f32 %v5593_v9, %v6687_v29 }
 0x3b2   :  { %5614 = vrcp.f32 %v2285_v14  ;;  %v5597_v20 = vpop.eup %5596  ;;  %v2359_v52 = vmul.f32 %v5595_v12, %v6689_v62 }
 0x3b3   :  { %5616 = vrcp.f32 %v2282_v59  ;;  %v5599_v21 = vpop.eup %5598  ;;  %v2292_v43 = vadd.f32 1.0, %v5597_v20 }
 0x3b4   :  { %5618 = vrcp.f32 %v2281_v13  ;;  %v2291_v46 = vadd.f32 1.0, %v5599_v21 }
 0x3b5   :  { %v5601_v22 = vpop.eup %5600  ;;  %5620 = vrcp.f32 %v2292_v43  ;;  %v6810_v43 = vld [vmem:[%s7181_s3 + $0x38] sm:$0xff] }
 0x3b6   :  { %v5603_v23 = vpop.eup %5602  ;;  %v2336_v25 = vmul.f32 2.0, %v5601_v22  ;;  %5622 = vrcp.f32 %v2291_v46  ;;  %v6831_v46 = vld [vmem:[%s7181_s3 + $0x50] sm:$0xff] }
 0x3b7   :  { %v5605_v24 = vpop.eup %5604  ;;  %v2335_v40 = vmul.f32 2.0, %v5603_v23  ;;  %v6768_v23 = vld [vmem:[%s7181_s3 + $0x8] sm:$0xff] }
 0x3b8   :  { %v5607_v41 = vpop.eup %5606  ;;  %v4250_v42 = vadd.f32 -1.0, %v2336_v25  ;;  %v2294_v60 = vadd.f32 1.0, %v5605_v24  ;;  %v6775_v25 = vld [vmem:[%s7181_s3 + $0x10] sm:$0xff]  ;;  %v6782_v24 = vld [vmem:[%s7181_s3 + $0x18] sm:$0xff] }
 0x3b9   :  { %v5609_v44 = vpop.eup %5608  ;;  %v4249_v45 = vadd.f32 -1.0, %v2335_v40  ;;  %v2293_v36 = vadd.f32 1.0, %v5607_v41  ;;  %v6789_v40 = vld [vmem:[%s7181_s3 + $0x20] sm:$0xff]  ;;  %v6796_v41 = vld [vmem:[%s7181_s3 + $0x28] sm:$0xff] }
 0x3ba   :  { %v5611_v47 = vpop.eup %5610  ;;  %v2364_v49 = vmul.f32 %v5589_v32, %v4250_v42  ;;  %v2338_v50 = vmul.f32 2.0, %v5609_v44  ;;  %v6803_v42 = vld [vmem:[%s7181_s3 + $0x30] sm:$0xff]  ;;  %v6817_v44 = vld [vmem:[%s7181_s3 + $0x40] sm:$0xff] }
 0x3bb   :  { %v5613_v51 = vpop.eup %5612  ;;  %v2363_v53 = vmul.f32 %v5591_v35, %v4249_v45  ;;  %v2337_v54 = vmul.f32 2.0, %v5611_v47  ;;  %v6824_v45 = vld [vmem:[%s7181_s3 + $0x48] sm:$0xff]  ;;  %v6838_v47 = vld [vmem:[%s7181_s3 + $0x58] sm:$0xff] }
 0x3bc   :  { %v5615_v39 = vpop.eup %5614  ;;  %v6751_v0 = vadd.f32 %v2364_v49, %v2360_v48  ;;  %v4252_v28 = vadd.f32 -1.0, %v2338_v50  ;;  %v2362_v19 = vmul.f32 %v5613_v51, %v6695_v33  ;;  %v6845_v48 = vld [vmem:[%s7181_s3 + $0x60] sm:$0xff]  ;;  %v6852_v49 = vld [vmem:[%s7181_s3 + $0x68] sm:$0xff]  ;;  %v6859_v50 = vld [vmem:[%s7181_s3 + $0x70] sm:$0xff] }
 0x3bd   :  { %v5617_v37 = vpop.eup %5616  ;;  %v6753_v57 = vadd.f32 %v2363_v53, %v2359_v52  ;;  %v4251_v34 = vadd.f32 -1.0, %v2337_v54  ;;  %v2361_v56 = vmul.f32 %v5615_v39, %v6697_v58  ;;  %v6866_v51 = vld [vmem:[%s7181_s3 + $0x78] sm:$0xff]  ;;  %v6873_v52 = vld [vmem:[%s7181_s3] sm:$0xff] }
 0x3be   :  { %v5619_v29 = vpop.eup %5618  ;;  %5624 = vtanh.f32 %v6751_v0  ;;  %v2366_v62 = vmul.f32 %v5617_v37, %v4252_v28 }
 0x3bf   :  { %5626 = vtanh.f32 %v6753_v57  ;;  %v2365_v27 = vmul.f32 %v5619_v29, %v4251_v34  ;;  %v5621_v31 = vpop.eup %5620 }
 0x3c0   :  { %v6759_v16 = vadd.f32 %v2366_v62, %v2362_v19  ;;  %5628 = vrcp.f32 %v2294_v60  ;;  %v5623_v14 = vpop.eup %5622 }
 0x3c1   :  { %v6761_v4 = vadd.f32 %v2365_v27, %v2361_v56  ;;  %5630 = vrcp.f32 %v2293_v36 }
 0x3c2   :  { %5632 = vtanh.f32 %v6759_v16 }
 0x3c3   :  { %5634 = vtanh.f32 %v6761_v4 }
 0x3c8   :  { %v5625_v63 = vpop.eup %5624 }
 0x3c9   :  { %v5627_v33 = vpop.eup %5626  ;;  %v2376_v32 = vmul.f32 %v5625_v63, %v5621_v31 }
 0x3ca   :  { %v5629_v59 = vpop.eup %5628  ;;  %v2375_v35 = vmul.f32 %v5627_v33, %v5623_v14 }
 0x3cb   :  { %v5631_v13 = vpop.eup %5630 }
 0x3cc   :  { %v5633_v58 = vpop.eup %5632  ;;  %v5131_v9 = vpack.c.bf16 %v2376_v32, %v2375_v35 }
 0x3cd   :  { %v5635_v12 = vpop.eup %5634  ;;  %v2378_v20 = vmul.f32 %v5633_v58, %v5629_v59 }
 0x3ce   :  { %5132 = vmatprep.subr.bf16.mxu1 %v5131_v9  ;;  %v2377_v21 = vmul.f32 %v5635_v12, %v5631_v13 }
 0x3cf   :  { %5134 = vmatpush3.bf16.msra.mxu1 %v5131_v9 }
 0x3d0   :  { %v5135_v22 = vpack.c.bf16 %v2378_v20, %v2377_v21 }
 0x3d2   :  { %5136 = vmatprep.subr.bf16.mxu1 %v5135_v22 }
 0x3d3   :  { %5138 = vmatpush3.bf16.msra.mxu1 %v5135_v22 }
 0x3d6   :  { %4963 = vmatmul.mubr.msk.f32.vlgmr.msra.gmra.mrb[26].mxu1 %vm1355_vm2, %v6768_v23 }
 0x3d7   :  { %4965 = vmatprep.mubr.msk.f32.mxu1 %vm1355_vm2, %v6775_v25 }
 0x3da   :  { %4966 = vmatmul.mubr.msk.f32.gmra.mrb[28].mxu1 %vm1355_vm2, %v6782_v24 }
 0x3db   :  { %4968 = vmatprep.mubr.msk.f32.mxu1 %vm1355_vm2, %v6789_v40 }
 0x3de   :  { %4969 = vmatmul.mubr.msk.f32.gmra.mrb[30].mxu1 %vm1355_vm2, %v6796_v41 }
 0x3df   :  { %4971 = vmatprep.mubr.msk.f32.mxu1 %vm1355_vm2, %v6803_v42 }
 0x3e2   :  { %4972 = vmatmul.mubr.msk.f32.gmra.mrb[32].mxu1 %vm1355_vm2, %v6810_v43 }
 0x3e3   :  { %4974 = vmatprep.mubr.msk.f32.mxu1 %vm1355_vm2, %v6817_v44 }
 0x3e6   :  { %4975 = vmatmul.mubr.msk.f32.gmra.mrb[34].mxu1 %vm1355_vm2, %v6824_v45 }
 0x3e7   :  { %4977 = vmatprep.mubr.msk.f32.mxu1 %vm1355_vm2, %v6831_v46 }
 0x3ea   :  { %4978 = vmatmul.mubr.msk.f32.gmra.mrb[36].mxu1 %vm1355_vm2, %v6838_v47 }
 0x3eb   :  { %4980 = vmatprep.mubr.msk.f32.mxu1 %vm1355_vm2, %v6845_v48 }
 0x3ee   :  { %4981 = vmatmul.mubr.msk.f32.gmra.mrb[38].mxu1 %vm1355_vm2, %v6852_v49 }
 0x3ef   :  { %4983 = vmatprep.mubr.msk.f32.mxu1 %vm1355_vm2, %v6859_v50 }
 0x3f2   :  { %4984 = vmatmul.mubr.msk.f32.gmra.mrb[40].mxu1 %vm1355_vm2, %v6866_v51 }
 0x3f3   :  { %5026 = vmatprep.mubr.msk.f32.mxu1 %vm1355_vm2, %v6873_v52 }
 0x4a9   :  { %v4964_v53 = vpop.f32.mrb[26].mxu1 }
 0x4aa   :  { %v2445_v54 = vpop.f32.mrb[27].mxu1  ;;  %v5237_v60 = vadd.f32 %v4964_v53, %v6576_v6 }
 0x4ab   :  { %v5238_v37 = vadd.f32 %v2445_v54, %v6578_v7 }
 0x4ac   :  { %v4274_v19 = vmul.f32 -1.442695, %v5237_v60 }
 0x4ad   :  { %v4967_v39 = vpop.f32.mrb[28].mxu1  ;;  %v4273_v56 = vmul.f32 -1.442695, %v5238_v37 }
 0x4ae   :  { %v2455_v28 = vpop.f32.mrb[29].mxu1  ;;  %5636 = vpow2.f32 %v4274_v19  ;;  %v5239_v33 = vadd.f32 %v4967_v39, %v6593_v26 }
 0x4af   :  { %5638 = vpow2.f32 %v4273_v56  ;;  %v5240_v32 = vadd.f32 %v2455_v28, %v6597_v30 }
 0x4b0   :  { %v4276_v58 = vmul.f32 -1.442695, %v5239_v33 }
 0x4b1   :  { %v4970_v34 = vpop.f32.mrb[30].mxu1  ;;  %v4275_v20 = vmul.f32 -1.442695, %v5240_v32 }
 0x4b2   :  { %v5241_v36 = vadd.f32 %v4970_v34, %v6580_v8  ;;  %v2465_v29 = vpop.f32.mrb[31].mxu1 }
 0x4b3   :  { %v5242_v62 = vadd.f32 %v2465_v29, %v6582_v11 }
 0x4b4   :  { %v4278_v27 = vmul.f32 -1.442695, %v5241_v36 }
 0x4b5   :  { %v4973_v31 = vpop.f32.mrb[32].mxu1  ;;  %v4277_v14 = vmul.f32 -1.442695, %v5242_v62 }
 0x4b6   :  { %v2475_v63 = vpop.f32.mrb[33].mxu1  ;;  %5640 = vpow2.f32 %v4278_v27  ;;  %v5243_v9 = vadd.f32 %v4973_v31, %v6584_v15 }
 0x4b7   :  { %5642 = vpow2.f32 %v4277_v14  ;;  %v5244_v21 = vadd.f32 %v2475_v63, %v6587_v17 }
 0x4b8   :  { %5644 = vpow2.f32 %v4276_v58  ;;  %v4280_v37 = vmul.f32 -1.442695, %v5243_v9  ;;  %v5637_v62 = vpop.eup %5636 }
 0x4b9   :  { %v4976_v59 = vpop.f32.mrb[34].mxu1  ;;  %5646 = vpow2.f32 %v4275_v20  ;;  %v4279_v29 = vmul.f32 -1.442695, %v5244_v21  ;;  %v5639_v31 = vpop.eup %5638 }
 0x4ba   :  { %v5245_v35 = vadd.f32 %v4976_v59, %v6574_v5  ;;  %v2485_v13 = vpop.f32.mrb[35].mxu1  ;;  %v2604_v58 = vadd.f32 1.0, %v5639_v31 }
 0x4bb   :  { %v5246_v12 = vadd.f32 %v2485_v13, %v6570_v2 }
 0x4bc   :  { %v4270_v22 = vmul.f32 -2.0, %v5245_v35  ;;  %v2605_v35 = vadd.f32 1.0, %v5637_v62 }
 0x4bd   :  { %v4269_v53 = vmul.f32 -2.0, %v5246_v12  ;;  %v4979_v54 = vpop.f32.mrb[36].mxu1 }
 0x4be   :  { %v2590_v39 = vmul.f32 1.442695, %v4270_v22  ;;  %v5247_v28 = vadd.f32 %v4979_v54, %v6572_v3  ;;  %v2495_v60 = vpop.f32.mrb[37].mxu1 }
 0x4bf   :  { %v2588_v34 = vmul.f32 1.442695, %v4269_v53  ;;  %v5248_v36 = vadd.f32 %v2495_v60, %v6568_v1 }
 0x4c0   :  { %v4272_v19 = vmul.f32 -2.0, %v5247_v28  ;;  %5648 = vpow2.f32 %v2590_v39  ;;  %v5641_v33 = vpop.eup %5640 }
 0x4c1   :  { %v4271_v56 = vmul.f32 -2.0, %v5248_v36  ;;  %v4982_v27 = vpop.f32.mrb[38].mxu1  ;;  %5650 = vpow2.f32 %v2588_v34  ;;  %v5643_v59 = vpop.eup %5642  ;;  %v2609_v20 = vadd.f32 1.0, %v5641_v33 }
 0x4c2   :  { %v2594_v14 = vmul.f32 1.442695, %v4272_v19  ;;  %v2505_v63 = vpop.f32.mrb[39].mxu1  ;;  %5652 = vpow2.f32 %v4280_v37  ;;  %v5249_v13 = vadd.f32 %v4982_v27, %v6605_v10  ;;  %v2608_v22 = vadd.f32 1.0, %v5643_v59  ;;  %v5645_v39 = vpop.eup %5644 }
 0x4c3   :  { %v2592_v32 = vmul.f32 1.442695, %v4271_v56  ;;  %5654 = vpow2.f32 %v4279_v29  ;;  %v5250_v9 = vadd.f32 %v2505_v63, %v6609_v18  ;;  %v5647_v37 = vpop.eup %5646 }
 0x4c4   :  { %5656 = vpow2.f32 %v2594_v14  ;;  %v4282_v53 = vmul.f32 -1.442695, %v5249_v13 }
 0x4c5   :  { %v4985_v12 = vpop.f32.mrb[40].mxu1  ;;  %5658 = vpow2.f32 %v2592_v32  ;;  %v4281_v28 = vmul.f32 -1.442695, %v5250_v9 }
 0x4c6   :  { %v2515_v21 = vpop.f32.mrb[41].mxu1  ;;  %5660 = vrcp.f32 %v2605_v35  ;;  %v5251_v54 = vadd.f32 %v4985_v12, %v6617_v61  ;;  %v2606_v12 = vadd.f32 1.0, %v5647_v37 }
 0x4c7   :  { %5662 = vrcp.f32 %v2604_v58  ;;  %v5252_v60 = vadd.f32 %v2515_v21, %v6619_v55  ;;  %v2607_v58 = vadd.f32 1.0, %v5645_v39 }
 0x4c8   :  { %5664 = vrcp.f32 %v2609_v20  ;;  %v4284_v19 = vmul.f32 -1.442695, %v5251_v54 }
 0x4c9   :  { %5666 = vrcp.f32 %v2608_v22  ;;  %v4283_v27 = vmul.f32 -1.442695, %v5252_v60 }
 0x4ca   :  { %v5649_v34 = vpop.eup %5648  ;;  %5668 = vpow2.f32 %v4282_v53 }
 0x4cb   :  { %v5651_v36 = vpop.eup %5650  ;;  %v2613_v29 = vadd.f32 1.0, %v5649_v34  ;;  %5670 = vpow2.f32 %v4281_v28 }
 0x4cc   :  { %v5653_v62 = vpop.eup %5652  ;;  %v2612_v56 = vadd.f32 1.0, %v5651_v36 }
 0x4cd   :  { %v5655_v31 = vpop.eup %5654  ;;  %5672 = vrcp.f32 %v2613_v29  ;;  %v2611_v33 = vadd.f32 1.0, %v5653_v62 }
 0x4ce   :  { %v5657_v14 = vpop.eup %5656  ;;  %5674 = vrcp.f32 %v2612_v56  ;;  %v2610_v59 = vadd.f32 1.0, %v5655_v31 }
 0x4cf   :  { %v5659_v63 = vpop.eup %5658  ;;  %v2615_v32 = vadd.f32 1.0, %v5657_v14  ;;  %5676 = vpow2.f32 %v4284_v19 }
 0x4d0   :  { %v2614_v35 = vadd.f32 1.0, %v5659_v63  ;;  %5678 = vpow2.f32 %v4283_v27  ;;  %v5661_v13 = vpop.eup %5660 }
 0x4d1   :  { %5680 = vrcp.f32 %v2615_v32  ;;  %v5663_v9 = vpop.eup %5662 }
 0x4d2   :  { %5682 = vrcp.f32 %v2614_v35  ;;  %v5665_v20 = vpop.eup %5664 }
 0x4d3   :  { %5684 = vrcp.f32 %v2611_v33  ;;  %v5667_v21 = vpop.eup %5666  ;;  %v2685_v31 = vmul.f32 %v5665_v20, %v6751_v0 }
 0x4d4   :  { %5686 = vrcp.f32 %v2610_v59  ;;  %v5669_v22 = vpop.eup %5668  ;;  %v2684_v32 = vmul.f32 %v5667_v21, %v6753_v57 }
 0x4d5   :  { %5688 = vrcp.f32 %v2607_v58  ;;  %v5671_v53 = vpop.eup %5670  ;;  %v2617_v39 = vadd.f32 1.0, %v5669_v22 }
 0x4d6   :  { %5690 = vrcp.f32 %v2606_v12  ;;  %v2616_v37 = vadd.f32 1.0, %v5671_v53 }
 0x4d7   :  { %v5673_v54 = vpop.eup %5672  ;;  %5692 = vrcp.f32 %v2617_v39 }
 0x4d8   :  { %v5675_v28 = vpop.eup %5674  ;;  %v2661_v60 = vmul.f32 2.0, %v5673_v54  ;;  %5694 = vrcp.f32 %v2616_v37 }
 0x4d9   :  { %v5677_v34 = vpop.eup %5676  ;;  %v2660_v36 = vmul.f32 2.0, %v5675_v28 }
 0x4da   :  { %v5679_v29 = vpop.eup %5678  ;;  %v4286_v19 = vadd.f32 -1.0, %v2661_v60  ;;  %v2619_v28 = vadd.f32 1.0, %v5677_v34 }
 0x4db   :  { %v5681_v62 = vpop.eup %5680  ;;  %v4285_v56 = vadd.f32 -1.0, %v2660_v36  ;;  %v2618_v36 = vadd.f32 1.0, %v5679_v29 }
 0x4dc   :  { %v5683_v27 = vpop.eup %5682  ;;  %v2689_v14 = vmul.f32 %v5661_v13, %v4286_v19  ;;  %v2663_v63 = vmul.f32 2.0, %v5681_v62 }
 0x4dd   :  { %v5685_v33 = vpop.eup %5684  ;;  %v2688_v59 = vmul.f32 %v5663_v9, %v4285_v56  ;;  %v2662_v35 = vmul.f32 2.0, %v5683_v27 }
 0x4de   :  { %v5687_v58 = vpop.eup %5686  ;;  %v6895_v12 = vadd.f32 %v2689_v14, %v2685_v31  ;;  %v4288_v54 = vadd.f32 -1.0, %v2663_v63  ;;  %v2687_v13 = vmul.f32 %v5685_v33, %v6759_v16 }
 0x4df   :  { %v5689_v22 = vpop.eup %5688  ;;  %v6897_v60 = vadd.f32 %v2688_v59, %v2684_v32  ;;  %v4287_v53 = vadd.f32 -1.0, %v2662_v35  ;;  %v2686_v9 = vmul.f32 %v5687_v58, %v6761_v4 }
 0x4e0   :  { %v5691_v0 = vpop.eup %5690  ;;  %5696 = vtanh.f32 %v6895_v12  ;;  %v2691_v57 = vmul.f32 %v5689_v22, %v4288_v54 }
 0x4e1   :  { %5698 = vtanh.f32 %v6897_v60  ;;  %v2690_v20 = vmul.f32 %v5691_v0, %v4287_v53  ;;  %v5693_v29 = vpop.eup %5692 }
 0x4e2   :  { %v6903_v21 = vadd.f32 %v2691_v57, %v2687_v13  ;;  %5700 = vrcp.f32 %v2619_v28  ;;  %v5695_v19 = vpop.eup %5694 }
 0x4e3   :  { %v6905_v34 = vadd.f32 %v2690_v20, %v2686_v9  ;;  %5702 = vrcp.f32 %v2618_v36 }
 0x4e4   :  { %5704 = vtanh.f32 %v6903_v21 }
 0x4e5   :  { %5706 = vtanh.f32 %v6905_v34 }
 0x4ea   :  { %v5697_v39 = vpop.eup %5696 }
 0x4eb   :  { %v5699_v16 = vpop.eup %5698  ;;  %v2701_v62 = vmul.f32 %v5697_v39, %v5693_v29 }
 0x4ec   :  { %v5701_v56 = vpop.eup %5700  ;;  %v2700_v37 = vmul.f32 %v5699_v16, %v5695_v19 }
 0x4ed   :  { %v5703_v27 = vpop.eup %5702 }
 0x4ee   :  { %v5705_v4 = vpop.eup %5704  ;;  %v5139_v31 = vpack.c.bf16 %v2701_v62, %v2700_v37 }
 0x4ef   :  { %v5707_v14 = vpop.eup %5706  ;;  %v2703_v63 = vmul.f32 %v5705_v4, %v5701_v56 }
 0x4f0   :  { %5140 = vmatprep.subr.bf16.mxu0 %v5139_v31  ;;  %v2702_v33 = vmul.f32 %v5707_v14, %v5703_v27 }
 0x4f1   :  { %5142 = vmatpush3.bf16.msra.mxu0 %v5139_v31 }
 0x4f2   :  { %v5143_v32 = vpack.c.bf16 %v2703_v63, %v2702_v33 }
 0x4f4   :  { %5144 = vmatprep.subr.bf16.mxu0 %v5143_v32 }
 0x4f5   :  { %5146 = vmatpush3.bf16.msra.mxu0 %v5143_v32 }
 0x4f8   :  { %4995 = vmatmul.mubr.msk.f32.vlgmr.msra.gmra.mrb[22].mxu0 %vm1355_vm2, %v6768_v23 }
 0x4f9   :  { %4997 = vmatprep.mubr.msk.f32.mxu0 %vm1355_vm2, %v6775_v25 }
 0x4fc   :  { %4998 = vmatmul.mubr.msk.f32.gmra.mrb[24].mxu0 %vm1355_vm2, %v6782_v24 }
 0x4fd   :  { %5000 = vmatprep.mubr.msk.f32.mxu0 %vm1355_vm2, %v6789_v40 }
 0x500   :  { %5001 = vmatmul.mubr.msk.f32.gmra.mrb[26].mxu0 %vm1355_vm2, %v6796_v41 }
 0x501   :  { %5003 = vmatprep.mubr.msk.f32.mxu0 %vm1355_vm2, %v6803_v42 }
 0x504   :  { %5004 = vmatmul.mubr.msk.f32.gmra.mrb[28].mxu0 %vm1355_vm2, %v6810_v43 }
 0x505   :  { %5006 = vmatprep.mubr.msk.f32.mxu0 %vm1355_vm2, %v6817_v44 }
 0x508   :  { %5007 = vmatmul.mubr.msk.f32.gmra.mrb[30].mxu0 %vm1355_vm2, %v6824_v45 }
 0x509   :  { %5009 = vmatprep.mubr.msk.f32.mxu0 %vm1355_vm2, %v6831_v46 }
 0x50c   :  { %5010 = vmatmul.mubr.msk.f32.gmra.mrb[32].mxu0 %vm1355_vm2, %v6838_v47 }
 0x50d   :  { %5012 = vmatprep.mubr.msk.f32.mxu0 %vm1355_vm2, %v6845_v48 }
 0x510   :  { %5013 = vmatmul.mubr.msk.f32.gmra.mrb[34].mxu0 %vm1355_vm2, %v6852_v49 }
 0x511   :  { %5015 = vmatprep.mubr.msk.f32.mxu0 %vm1355_vm2, %v6859_v50 }
 0x514   :  { %5016 = vmatmul.mubr.msk.f32.gmra.mrb[36].mxu0 %vm1355_vm2, %v6866_v51 }
 0x515   :  { %5058 = vmatprep.mubr.msk.f32.mxu0 %vm1355_vm2, %v6873_v52 }
 0x5cb   :  { %v4996_v59 = vpop.f32.mrb[22].mxu0 }
 0x5cc   :  { %v2770_v35 = vpop.f32.mrb[23].mxu0  ;;  %v5253_v28 = vadd.f32 %v4996_v59, %v6576_v6 }
 0x5cd   :  { %v5254_v22 = vadd.f32 %v2770_v35, %v6578_v7 }
 0x5ce   :  { %v4310_v13 = vmul.f32 -1.442695, %v5253_v28 }
 0x5cf   :  { %v4999_v58 = vpop.f32.mrb[24].mxu0  ;;  %v4309_v9 = vmul.f32 -1.442695, %v5254_v22 }
 0x5d0   :  { %v2780_v54 = vpop.f32.mrb[25].mxu0  ;;  %5708 = vpow2.f32 %v4310_v13  ;;  %v5255_v39 = vadd.f32 %v4999_v58, %v6593_v26 }
 0x5d1   :  { %5710 = vpow2.f32 %v4309_v9  ;;  %v5256_v16 = vadd.f32 %v2780_v54, %v6597_v30 }
 0x5d2   :  { %v4312_v27 = vmul.f32 -1.442695, %v5255_v39 }
 0x5d3   :  { %v5002_v53 = vpop.f32.mrb[26].mxu0  ;;  %v4311_v14 = vmul.f32 -1.442695, %v5256_v16 }
 0x5d4   :  { %v5257_v36 = vadd.f32 %v5002_v53, %v6580_v8  ;;  %v2790_v0 = vpop.f32.mrb[27].mxu0 }
 0x5d5   :  { %v5258_v57 = vadd.f32 %v2790_v0, %v6582_v11 }
 0x5d6   :  { %v4314_v20 = vmul.f32 -1.442695, %v5257_v36 }
 0x5d7   :  { %v5005_v29 = vpop.f32.mrb[28].mxu0  ;;  %v4313_v19 = vmul.f32 -1.442695, %v5258_v57 }
 0x5d8   :  { %v2800_v52 = vpop.f32.mrb[29].mxu0  ;;  %5712 = vpow2.f32 %v4314_v20  ;;  %v5259_v4 = vadd.f32 %v5005_v29, %v6584_v15 }
 0x5d9   :  { %5714 = vpow2.f32 %v4313_v19  ;;  %v5260_v63 = vadd.f32 %v2800_v52, %v6587_v17 }
 0x5da   :  { %5716 = vpow2.f32 %v4312_v27  ;;  %v4316_v28 = vmul.f32 -1.442695, %v5259_v4  ;;  %v5709_v13 = vpop.eup %5708 }
 0x5db   :  { %v5008_v62 = vpop.f32.mrb[30].mxu0  ;;  %5718 = vpow2.f32 %v4311_v14  ;;  %v4315_v36 = vmul.f32 -1.442695, %v5260_v63  ;;  %v5711_v20 = vpop.eup %5710 }
 0x5dc   :  { %v5261_v56 = vadd.f32 %v5008_v62, %v6574_v5  ;;  %v2810_v37 = vpop.f32.mrb[31].mxu0  ;;  %v2930_v62 = vadd.f32 1.0, %v5709_v13 }
 0x5dd   :  { %v5262_v31 = vadd.f32 %v2810_v37, %v6570_v2  ;;  %v2929_v37 = vadd.f32 1.0, %v5711_v20 }
 0x5de   :  { %v4306_v33 = vmul.f32 -2.0, %v5261_v56 }
 0x5df   :  { %v4305_v32 = vmul.f32 -2.0, %v5262_v31  ;;  %v5011_v59 = vpop.f32.mrb[32].mxu0 }
 0x5e0   :  { %v2915_v35 = vmul.f32 1.442695, %v4306_v33  ;;  %v5263_v58 = vadd.f32 %v5011_v59, %v6572_v3  ;;  %v2820_v54 = vpop.f32.mrb[33].mxu0 }
 0x5e1   :  { %v2913_v22 = vmul.f32 1.442695, %v4305_v32  ;;  %v5264_v53 = vadd.f32 %v2820_v54, %v6568_v1 }
 0x5e2   :  { %v4308_v0 = vmul.f32 -2.0, %v5263_v58  ;;  %5720 = vpow2.f32 %v2915_v35  ;;  %v5713_v52 = vpop.eup %5712 }
 0x5e3   :  { %v4307_v57 = vmul.f32 -2.0, %v5264_v53  ;;  %v5014_v9 = vpop.f32.mrb[34].mxu0  ;;  %5722 = vpow2.f32 %v2913_v22  ;;  %v5715_v16 = vpop.eup %5714  ;;  %v2934_v31 = vadd.f32 1.0, %v5713_v52 }
 0x5e4   :  { %v2919_v29 = vmul.f32 1.442695, %v4308_v0  ;;  %v2830_v19 = vpop.f32.mrb[35].mxu0  ;;  %5724 = vpow2.f32 %v4316_v28  ;;  %v5265_v56 = vadd.f32 %v5014_v9, %v6605_v10  ;;  %v2933_v63 = vadd.f32 1.0, %v5715_v16  ;;  %v5717_v59 = vpop.eup %5716 }
 0x5e5   :  { %v2917_v39 = vmul.f32 1.442695, %v4307_v57  ;;  %5726 = vpow2.f32 %v4315_v36  ;;  %v5266_v27 = vadd.f32 %v2830_v19, %v6609_v18  ;;  %v5719_v54 = vpop.eup %5718 }
 0x5e6   :  { %5728 = vpow2.f32 %v2919_v29  ;;  %v4318_v33 = vmul.f32 -1.442695, %v5265_v56  ;;  %v2932_v56 = vadd.f32 1.0, %v5717_v59 }
 0x5e7   :  { %v5017_v4 = vpop.f32.mrb[36].mxu0  ;;  %5730 = vpow2.f32 %v2917_v39  ;;  %v4317_v35 = vmul.f32 -1.442695, %v5266_v27  ;;  %v2931_v27 = vadd.f32 1.0, %v5719_v54 }
 0x5e8   :  { %v2840_v14 = vpop.f32.mrb[37].mxu0  ;;  %5732 = vrcp.f32 %v2930_v62  ;;  %v5267_v32 = vadd.f32 %v5017_v4, %v6617_v61 }
 0x5e9   :  { %5734 = vrcp.f32 %v2929_v37  ;;  %v5268_v58 = vadd.f32 %v2840_v14, %v6619_v55 }
 0x5ea   :  { %5736 = vrcp.f32 %v2934_v31  ;;  %v4320_v36 = vmul.f32 -1.442695, %v5267_v32 }
 0x5eb   :  { %5738 = vrcp.f32 %v2933_v63  ;;  %v4319_v57 = vmul.f32 -1.442695, %v5268_v58 }
 0x5ec   :  { %v5721_v28 = vpop.eup %5720  ;;  %5740 = vpow2.f32 %v4318_v33 }
 0x5ed   :  { %v5723_v22 = vpop.eup %5722  ;;  %v2938_v53 = vadd.f32 1.0, %v5721_v28  ;;  %5742 = vpow2.f32 %v4317_v35 }
 0x5ee   :  { %v5725_v0 = vpop.eup %5724  ;;  %v2937_v13 = vadd.f32 1.0, %v5723_v22 }
 0x5ef   :  { %v5727_v9 = vpop.eup %5726  ;;  %5744 = vrcp.f32 %v2938_v53  ;;  %v2936_v19 = vadd.f32 1.0, %v5725_v0 }
 0x5f0   :  { %v5729_v20 = vpop.eup %5728  ;;  %5746 = vrcp.f32 %v2937_v13  ;;  %v2935_v39 = vadd.f32 1.0, %v5727_v9 }
 0x5f1   :  { %v5731_v29 = vpop.eup %5730  ;;  %v2940_v52 = vadd.f32 1.0, %v5729_v20  ;;  %5748 = vpow2.f32 %v4320_v36 }
 0x5f2   :  { %v2939_v16 = vadd.f32 1.0, %v5731_v29  ;;  %5750 = vpow2.f32 %v4319_v57  ;;  %v5733_v62 = vpop.eup %5732 }
 0x5f3   :  { %5752 = vrcp.f32 %v2940_v52  ;;  %v5735_v37 = vpop.eup %5734 }
 0x5f4   :  { %5754 = vrcp.f32 %v2939_v16  ;;  %v5737_v4 = vpop.eup %5736 }
 0x5f5   :  { %5756 = vrcp.f32 %v2936_v19  ;;  %v5739_v31 = vpop.eup %5738  ;;  %v3010_v57 = vmul.f32 %v5737_v4, %v6895_v12 }
 0x5f6   :  { %5758 = vrcp.f32 %v2935_v39  ;;  %v5741_v14 = vpop.eup %5740  ;;  %v3009_v19 = vmul.f32 %v5739_v31, %v6897_v60 }
 0x5f7   :  { %5760 = vrcp.f32 %v2932_v56  ;;  %v5743_v63 = vpop.eup %5742  ;;  %v2942_v59 = vadd.f32 1.0, %v5741_v14 }
 0x5f8   :  { %5762 = vrcp.f32 %v2931_v27  ;;  %v2941_v54 = vadd.f32 1.0, %v5743_v63 }
 0x5f9   :  { %v5745_v33 = vpop.eup %5744  ;;  %5764 = vrcp.f32 %v2942_v59 }
 0x5fa   :  { %v5747_v32 = vpop.eup %5746  ;;  %v2986_v35 = vmul.f32 2.0, %v5745_v33  ;;  %5766 = vrcp.f32 %v2941_v54 }
 0x5fb   :  { %v5749_v58 = vpop.eup %5748  ;;  %v2985_v28 = vmul.f32 2.0, %v5747_v32 }
 0x5fc   :  { %v5751_v22 = vpop.eup %5750  ;;  %v4322_v53 = vadd.f32 -1.0, %v2986_v35  ;;  %v2944_v33 = vadd.f32 1.0, %v5749_v58 }
 0x5fd   :  { %v5753_v36 = vpop.eup %5752  ;;  %v4321_v0 = vadd.f32 -1.0, %v2985_v28  ;;  %v2943_v35 = vadd.f32 1.0, %v5751_v22 }
 0x5fe   :  { %v5755_v13 = vpop.eup %5754  ;;  %v3014_v9 = vmul.f32 %v5733_v62, %v4322_v53  ;;  %v2988_v20 = vmul.f32 2.0, %v5753_v36 }
 0x5ff   :  { %v5757_v29 = vpop.eup %5756  ;;  %v3013_v52 = vmul.f32 %v5735_v37, %v4321_v0  ;;  %v2987_v39 = vmul.f32 2.0, %v5755_v13 }
 0x600   :  { %v5759_v16 = vpop.eup %5758  ;;  %v6959_v56 = vadd.f32 %v3014_v9, %v3010_v57  ;;  %v4324_v27 = vadd.f32 -1.0, %v2988_v20  ;;  %v3012_v62 = vmul.f32 %v5757_v29, %v6903_v21 }
 0x601   :  { %v5761_v14 = vpop.eup %5760  ;;  %v6961_v32 = vadd.f32 %v3013_v52, %v3009_v19  ;;  %v4323_v63 = vadd.f32 -1.0, %v2987_v39  ;;  %v3011_v37 = vmul.f32 %v5759_v16, %v6905_v34 }
 0x602   :  { %v5763_v12 = vpop.eup %5762  ;;  %5768 = vtanh.f32 %v6959_v56  ;;  %v3016_v60 = vmul.f32 %v5761_v14, %v4324_v27 }
 0x603   :  { %5770 = vtanh.f32 %v6961_v32  ;;  %v3015_v4 = vmul.f32 %v5763_v12, %v4323_v63  ;;  %v5765_v28 = vpop.eup %5764 }
 0x604   :  { %v6967_v31 = vadd.f32 %v3016_v60, %v3012_v62  ;;  %5772 = vrcp.f32 %v2944_v33  ;;  %v5767_v22 = vpop.eup %5766 }
 0x605   :  { %v6969_v58 = vadd.f32 %v3015_v4, %v3011_v37  ;;  %5774 = vrcp.f32 %v2943_v35 }
 0x606   :  { %5776 = vtanh.f32 %v6967_v31 }
 0x607   :  { %5778 = vtanh.f32 %v6969_v58 }
 0x60c   :  { %v5769_v53 = vpop.eup %5768 }
 0x60d   :  { %v5771_v21 = vpop.eup %5770  ;;  %v3026_v59 = vmul.f32 %v5769_v53, %v5765_v28 }
 0x60e   :  { %v5773_v36 = vpop.eup %5772  ;;  %v3025_v0 = vmul.f32 %v5771_v21, %v5767_v22 }
 0x60f   :  { %v5775_v54 = vpop.eup %5774 }
 0x610   :  { %v5777_v34 = vpop.eup %5776  ;;  %v5147_v13 = vpack.c.bf16 %v3026_v59, %v3025_v0 }
 0x611   :  { %v5779_v57 = vpop.eup %5778  ;;  %v3028_v9 = vmul.f32 %v5777_v34, %v5773_v36 }
 0x612   :  { %5148 = vmatprep.subr.bf16.mxu1 %v5147_v13  ;;  %v3027_v20 = vmul.f32 %v5779_v57, %v5775_v54 }
 0x613   :  { %5150 = vmatpush3.bf16.msra.mxu1 %v5147_v13 }
 0x614   :  { %v5151_v29 = vpack.c.bf16 %v3028_v9, %v3027_v20 }
 0x616   :  { %5152 = vmatprep.subr.bf16.mxu1 %v5151_v29 }
 0x617   :  { %5154 = vmatpush3.bf16.msra.mxu1 %v5151_v29 }
 0x61a   :  { %5027 = vmatmul.mubr.msk.f32.vlgmr.msra.gmra.mrb[42].mxu1 %vm1355_vm2, %v6768_v23 }
 0x61b   :  { %5029 = vmatprep.mubr.msk.f32.mxu1 %vm1355_vm2, %v6775_v25 }
 0x61e   :  { %5030 = vmatmul.mubr.msk.f32.gmra.mrb[44].mxu1 %vm1355_vm2, %v6782_v24 }
 0x61f   :  { %5032 = vmatprep.mubr.msk.f32.mxu1 %vm1355_vm2, %v6789_v40 }
 0x622   :  { %5033 = vmatmul.mubr.msk.f32.gmra.mrb[46].mxu1 %vm1355_vm2, %v6796_v41 }
 0x623   :  { %5035 = vmatprep.mubr.msk.f32.mxu1 %vm1355_vm2, %v6803_v42 }
 0x626   :  { %5036 = vmatmul.mubr.msk.f32.gmra.mrb[48].mxu1 %vm1355_vm2, %v6810_v43 }
 0x627   :  { %5038 = vmatprep.mubr.msk.f32.mxu1 %vm1355_vm2, %v6817_v44 }
 0x62a   :  { %5039 = vmatmul.mubr.msk.f32.gmra.mrb[50].mxu1 %vm1355_vm2, %v6824_v45 }
 0x62b   :  { %5041 = vmatprep.mubr.msk.f32.mxu1 %vm1355_vm2, %v6831_v46 }
 0x62e   :  { %5042 = vmatmul.mubr.msk.f32.gmra.mrb[52].mxu1 %vm1355_vm2, %v6838_v47 }
 0x62f   :  { %5044 = vmatprep.mubr.msk.f32.mxu1 %vm1355_vm2, %v6845_v48 }
 0x632   :  { %5045 = vmatmul.mubr.msk.f32.gmra.mrb[54].mxu1 %vm1355_vm2, %v6852_v49 }
 0x633   :  { %5047 = vmatprep.mubr.msk.f32.mxu1 %vm1355_vm2, %v6859_v50 }
 0x636   :  { %5048 = vmatmul.mubr.msk.f32.gmra.mrb[56].mxu1 %vm1355_vm2, %v6866_v51 }
 0x6ed   :  { %v5028_v23 = vpop.f32.mrb[42].mxu1 }
 0x6ee   :  { %v3095_v25 = vpop.f32.mrb[43].mxu1  ;;  %v5269_v41 = vadd.f32 %v5028_v23, %v6576_v6 }
 0x6ef   :  { %v5270_v42 = vadd.f32 %v3095_v25, %v6578_v7 }
 0x6f0   :  { %v4346_v46 = vmul.f32 -1.442695, %v5269_v41 }
 0x6f1   :  { %v5031_v24 = vpop.f32.mrb[44].mxu1  ;;  %v4345_v48 = vmul.f32 -1.442695, %v5270_v42 }
 0x6f2   :  { %v3105_v40 = vpop.f32.mrb[45].mxu1  ;;  %5780 = vpow2.f32 %v4346_v46  ;;  %v5271_v52 = vadd.f32 %v5031_v24, %v6593_v26 }
 0x6f3   :  { %5782 = vpow2.f32 %v4345_v48  ;;  %v5272_v39 = vadd.f32 %v3105_v40, %v6597_v30 }
 0x6f4   :  { %v4348_v14 = vmul.f32 -1.442695, %v5271_v52 }
 0x6f5   :  { %v5034_v43 = vpop.f32.mrb[46].mxu1  ;;  %v4347_v12 = vmul.f32 -1.442695, %v5272_v39 }
 0x6f6   :  { %v5273_v44 = vadd.f32 %v5034_v43, %v6580_v8  ;;  %v3115_v45 = vpop.f32.mrb[47].mxu1 }
 0x6f7   :  { %v5274_v47 = vadd.f32 %v3115_v45, %v6582_v11 }
 0x6f8   :  { %v4350_v49 = vmul.f32 -1.442695, %v5273_v44 }
 0x6f9   :  { %v5037_v50 = vpop.f32.mrb[48].mxu1  ;;  %v4349_v19 = vmul.f32 -1.442695, %v5274_v47 }
 0x6fa   :  { %v3125_v51 = vpop.f32.mrb[49].mxu1  ;;  %5784 = vpow2.f32 %v4350_v49  ;;  %v5275_v63 = vadd.f32 %v5037_v50, %v6584_v15 }
 0x6fb   :  { %5786 = vpow2.f32 %v4349_v19  ;;  %v5276_v62 = vadd.f32 %v3125_v51, %v6587_v17 }
 0x6fc   :  { %5788 = vpow2.f32 %v4348_v14  ;;  %v4352_v21 = vmul.f32 -1.442695, %v5275_v63  ;;  %v5781_v34 = vpop.eup %5780 }
 0x6fd   :  { %v5040_v16 = vpop.f32.mrb[50].mxu1  ;;  %5790 = vpow2.f32 %v4347_v12  ;;  %v4351_v0 = vmul.f32 -1.442695, %v5276_v62  ;;  %v5783_v9 = vpop.eup %5782  ;;  %v3255_v40 = vadd.f32 1.0, %v5781_v34 }
 0x6fe   :  { %v5277_v27 = vadd.f32 %v5040_v16, %v6574_v5  ;;  %v3135_v33 = vpop.f32.mrb[51].mxu1  ;;  %v3254_v42 = vadd.f32 1.0, %v5783_v9 }
 0x6ff   :  { %v5278_v35 = vadd.f32 %v3135_v33, %v6570_v2 }
 0x700   :  { %v4342_v60 = vmul.f32 -2.0, %v5277_v27 }
 0x701   :  { %v4341_v37 = vmul.f32 -2.0, %v5278_v35  ;;  %v5043_v4 = vpop.f32.mrb[52].mxu1 }
 0x702   :  { %v3240_v28 = vmul.f32 1.442695, %v4342_v60  ;;  %v5279_v22 = vadd.f32 %v5043_v4, %v6572_v3  ;;  %v3145_v53 = vpop.f32.mrb[53].mxu1 }
 0x703   :  { %v3238_v59 = vmul.f32 1.442695, %v4341_v37  ;;  %v5280_v36 = vadd.f32 %v3145_v53, %v6568_v1 }
 0x704   :  { %v4344_v54 = vmul.f32 -2.0, %v5279_v22  ;;  %5792 = vpow2.f32 %v3240_v28  ;;  %v5785_v23 = vpop.eup %5784 }
 0x705   :  { %v4343_v13 = vmul.f32 -2.0, %v5280_v36  ;;  %v5046_v57 = vpop.f32.mrb[54].mxu1  ;;  %5794 = vpow2.f32 %v3238_v59  ;;  %v5787_v24 = vpop.eup %5786  ;;  %v3259_v45 = vadd.f32 1.0, %v5785_v23 }
 0x706   :  { %v3244_v20 = vmul.f32 1.442695, %v4344_v54  ;;  %v3155_v29 = vpop.f32.mrb[55].mxu1  ;;  %5796 = vpow2.f32 %v4352_v21  ;;  %v5281_v41 = vadd.f32 %v5046_v57, %v6605_v10  ;;  %v3258_v47 = vadd.f32 1.0, %v5787_v24  ;;  %v5789_v50 = vpop.eup %5788 }
 0x707   :  { %v3242_v25 = vmul.f32 1.442695, %v4343_v13  ;;  %5798 = vpow2.f32 %v4351_v0  ;;  %v5282_v43 = vadd.f32 %v3155_v29, %v6609_v18  ;;  %v5791_v52 = vpop.eup %5790  ;;  %v3257_v21 = vadd.f32 1.0, %v5789_v50 }
 0x708   :  { %5800 = vpow2.f32 %v3244_v20  ;;  %v4354_v48 = vmul.f32 -1.442695, %v5281_v41  ;;  %v3256_v36 = vadd.f32 1.0, %v5791_v52 }
 0x709   :  { %v5049_v44 = vpop.f32.mrb[56].mxu1  ;;  %5802 = vpow2.f32 %v3242_v25  ;;  %v4353_v19 = vmul.f32 -1.442695, %v5282_v43 }
 0x70a   :  { %v3165_v46 = vpop.f32.mrb[57].mxu1  ;;  %5804 = vrcp.f32 %v3255_v40  ;;  %v5283_v49 = vadd.f32 %v5049_v44, %v6617_v61 }
 0x70b   :  { %5806 = vrcp.f32 %v3254_v42  ;;  %v5284_v51 = vadd.f32 %v3165_v46, %v6619_v55 }
 0x70c   :  { %5808 = vrcp.f32 %v3259_v45  ;;  %v4356_v33 = vmul.f32 -1.442695, %v5283_v49 }
 0x70d   :  { %5810 = vrcp.f32 %v3258_v47  ;;  %v4355_v35 = vmul.f32 -1.442695, %v5284_v51 }
 0x70e   :  { %v5793_v39 = vpop.eup %5792  ;;  %5812 = vpow2.f32 %v4354_v48 }
 0x70f   :  { %v5795_v16 = vpop.eup %5794  ;;  %v3263_v27 = vadd.f32 1.0, %v5793_v39  ;;  %5814 = vpow2.f32 %v4353_v19 }
 0x710   :  { %v5797_v14 = vpop.eup %5796  ;;  %v3262_v63 = vadd.f32 1.0, %v5795_v16 }
 0x711   :  { %v5799_v12 = vpop.eup %5798  ;;  %5816 = vrcp.f32 %v3263_v27  ;;  %v3261_v37 = vadd.f32 1.0, %v5797_v14 }
 0x712   :  { %v5801_v62 = vpop.eup %5800  ;;  %5818 = vrcp.f32 %v3262_v63  ;;  %v3260_v28 = vadd.f32 1.0, %v5799_v12 }
 0x713   :  { %v5803_v60 = vpop.eup %5802  ;;  %v3265_v4 = vadd.f32 1.0, %v5801_v62  ;;  %5820 = vpow2.f32 %v4356_v33 }
 0x714   :  { %v3264_v22 = vadd.f32 1.0, %v5803_v60  ;;  %5822 = vpow2.f32 %v4355_v35  ;;  %v5805_v53 = vpop.eup %5804 }
 0x715   :  { %5824 = vrcp.f32 %v3265_v4  ;;  %v5807_v59 = vpop.eup %5806 }
 0x716   :  { %5826 = vrcp.f32 %v3264_v22  ;;  %v5809_v0 = vpop.eup %5808 }
 0x717   :  { %5828 = vrcp.f32 %v3261_v37  ;;  %v5811_v54 = vpop.eup %5810  ;;  %v3335_v45 = vmul.f32 %v5809_v0, %v6959_v56 }
 0x718   :  { %5830 = vrcp.f32 %v3260_v28  ;;  %v5813_v34 = vpop.eup %5812  ;;  %v3334_v49 = vmul.f32 %v5811_v54, %v6961_v32 }
 0x719   :  { %5832 = vrcp.f32 %v3257_v21  ;;  %v5815_v13 = vpop.eup %5814  ;;  %v3267_v40 = vadd.f32 1.0, %v5813_v34 }
 0x71a   :  { %5834 = vrcp.f32 %v3256_v36  ;;  %v3266_v43 = vadd.f32 1.0, %v5815_v13 }
 0x71b   :  { %v5817_v57 = vpop.eup %5816  ;;  %5836 = vrcp.f32 %v3267_v40  ;;  %v5950_v40 = vld [vmem:[%s7181_s3 + $0x38] sm:$0xff] }
 0x71c   :  { %v5819_v9 = vpop.eup %5818  ;;  %v3311_v20 = vmul.f32 2.0, %v5817_v57  ;;  %5838 = vrcp.f32 %v3266_v43  ;;  %v5953_v43 = vld [vmem:[%s7181_s3 + $0x50] sm:$0xff] }
 0x71d   :  { %v5821_v29 = vpop.eup %5820  ;;  %v3310_v23 = vmul.f32 2.0, %v5819_v9  ;;  %v5944_v9 = vld [vmem:[%s7181_s3 + $0x8] sm:$0xff] }
 0x71e   :  { %v5823_v25 = vpop.eup %5822  ;;  %v4358_v24 = vadd.f32 -1.0, %v3311_v20  ;;  %v3269_v16 = vadd.f32 1.0, %v5821_v29  ;;  %v5945_v20 = vld [vmem:[%s7181_s3 + $0x10] sm:$0xff]  ;;  %v5946_v29 = vld [vmem:[%s7181_s3 + $0x18] sm:$0xff] }
 0x71f   :  { %v5825_v41 = vpop.eup %5824  ;;  %v4357_v42 = vadd.f32 -1.0, %v3310_v23  ;;  %v3268_v63 = vadd.f32 1.0, %v5823_v25  ;;  %v5947_v23 = vld [vmem:[%s7181_s3 + $0x20] sm:$0xff]  ;;  %v5948_v25 = vld [vmem:[%s7181_s3 + $0x28] sm:$0xff] }
 0x720   :  { %v5827_v44 = vpop.eup %5826  ;;  %v3339_v46 = vmul.f32 %v5805_v53, %v4358_v24  ;;  %v3313_v47 = vmul.f32 2.0, %v5825_v41  ;;  %v5949_v24 = vld [vmem:[%s7181_s3 + $0x30] sm:$0xff]  ;;  %v5951_v41 = vld [vmem:[%s7181_s3 + $0x40] sm:$0xff] }
 0x721   :  { %v5829_v48 = vpop.eup %5828  ;;  %v3338_v50 = vmul.f32 %v5807_v59, %v4357_v42  ;;  %v3312_v19 = vmul.f32 2.0, %v5827_v44  ;;  %v5952_v42 = vld [vmem:[%s7181_s3 + $0x48] sm:$0xff]  ;;  %v5954_v44 = vld [vmem:[%s7181_s3 + $0x58] sm:$0xff] }
 0x722   :  { %v5831_v51 = vpop.eup %5830  ;;  %v7021_v52 = vadd.f32 %v3339_v46, %v3335_v45  ;;  %v4360_v39 = vadd.f32 -1.0, %v3313_v47  ;;  %v3337_v35 = vmul.f32 %v5829_v48, %v6967_v31  ;;  %v5955_v45 = vld [vmem:[%s7181_s3 + $0x60] sm:$0xff]  ;;  %v5956_v46 = vld [vmem:[%s7181_s3 + $0x68] sm:$0xff]  ;;  %v5957_v47 = vld [vmem:[%s7181_s3 + $0x70] sm:$0xff] }
 0x723   :  { %v5833_v27 = vpop.eup %5832  ;;  %v7023_v33 = vadd.f32 %v3338_v50, %v3334_v49  ;;  %v4359_v14 = vadd.f32 -1.0, %v3312_v19  ;;  %v3336_v12 = vmul.f32 %v5831_v51, %v6969_v58  ;;  %v5958_v48 = vld [vmem:[%s7181_s3 + $0x78] sm:$0xff]  ;;  %v3684_v49 = vld [vmem:[%s7183_s5] sm:$0xff]  ;;  %v5989_v50 = vmov 1   ;;  %v5959_v19 = vld [vmem:[%s7185_s7 + $0x8] sm:$0xff] }
 0x724   :  { %v5835_v56 = vpop.eup %5834  ;;  %5840 = vtanh.f32 %v7021_v52  ;;  %v3341_v32 = vmul.f32 %v5833_v27, %v4360_v39  ;;  %5090 = vmatprep.mubr.msk.f32.mxu1 %vm1355_vm2, %v3684_v49  ;;  %5417 = vset.pattern.permute.xlu1 %v5989_v50  ;;  %v5960_v51 = vld [vmem:[%s7185_s7] sm:$0xff]  ;;  %v5961_v39 = vld [vmem:[%s7185_s7 + $0x10] sm:$0xff] }
 0x725   :  { %5842 = vtanh.f32 %v7023_v33  ;;  %v3340_v62 = vmul.f32 %v5835_v56, %v4359_v14  ;;  %v5837_v4 = vpop.eup %5836  ;;  %5416 = vset.pattern.permute.xlu0 %v5989_v50  ;;  %3892 = vperm.xlu1 %5417, %v5959_v19  }
 0x726   :  { %v7029_v60 = vadd.f32 %v3341_v32, %v3337_v35  ;;  %5844 = vrcp.f32 %v3269_v16  ;;  %v5839_v28 = vpop.eup %5838  ;;  %3888 = vperm.xlu0 %5416, %v5960_v51   ;;  %v5962_v16 = vld [vmem:[%s7185_s7 + $0x18] sm:$0xff] }
 0x727   :  { %v7031_v37 = vadd.f32 %v3340_v62, %v3336_v12  ;;  %5846 = vrcp.f32 %v3268_v63 }
 0x728   :  { %5848 = vtanh.f32 %v7029_v60 }
 0x729   :  { %5850 = vtanh.f32 %v7031_v37  ;;  %3896 = vperm.xlu1 %5417, %v5961_v39  }
 0x72a   :  { %3900 = vperm.xlu0 %5416, %v5962_v16  }
 0x72e   :  { %v5841_v22 = vpop.eup %5840 }
 0x72f   :  { %v5843_v31 = vpop.eup %5842  ;;  %v3351_v53 = vmul.f32 %v5841_v22, %v5837_v4 }
 0x730   :  { %v5845_v21 = vpop.eup %5844  ;;  %v3350_v59 = vmul.f32 %v5843_v31, %v5839_v28 }
 0x731   :  { %v5847_v36 = vpop.eup %5846 }
 0x732   :  { %v5849_v58 = vpop.eup %5848  ;;  %v5155_v0 = vpack.c.bf16 %v3351_v53, %v3350_v59 }
 0x733   :  { %v5851_v54 = vpop.eup %5850  ;;  %v3353_v34 = vmul.f32 %v5849_v58, %v5845_v21 }
 0x734   :  { %5156 = vmatprep.subr.bf16.mxu0 %v5155_v0  ;;  %v3352_v13 = vmul.f32 %v5851_v54, %v5847_v36 }
 0x735   :  { %5158 = vmatpush3.bf16.msra.mxu0 %v5155_v0 }
 0x736   :  { %v5159_v57 = vpack.c.bf16 %v3353_v34, %v3352_v13 }
 0x738   :  { %5160 = vmatprep.subr.bf16.mxu0 %v5159_v57 }
 0x739   :  { %5162 = vmatpush3.bf16.msra.mxu0 %v5159_v57 }
 0x73c   :  { %5059 = vmatmul.mubr.msk.f32.vlgmr.msra.gmra.mrb[38].mxu0 %vm1355_vm2, %v5944_v9 }
 0x73d   :  { %5061 = vmatprep.mubr.msk.f32.mxu0 %vm1355_vm2, %v5945_v20 }
 0x740   :  { %5062 = vmatmul.mubr.msk.f32.gmra.mrb[40].mxu0 %vm1355_vm2, %v5946_v29 }
 0x741   :  { %5064 = vmatprep.mubr.msk.f32.mxu0 %vm1355_vm2, %v5947_v23 }
 0x744   :  { %5065 = vmatmul.mubr.msk.f32.gmra.mrb[42].mxu0 %vm1355_vm2, %v5948_v25 }
 0x745   :  { %5067 = vmatprep.mubr.msk.f32.mxu0 %vm1355_vm2, %v5949_v24 }
 0x748   :  { %5068 = vmatmul.mubr.msk.f32.gmra.mrb[44].mxu0 %vm1355_vm2, %v5950_v40 }
 0x749   :  { %5070 = vmatprep.mubr.msk.f32.mxu0 %vm1355_vm2, %v5951_v41 }
 0x74c   :  { %5071 = vmatmul.mubr.msk.f32.gmra.mrb[46].mxu0 %vm1355_vm2, %v5952_v42 }
 0x74d   :  { %5073 = vmatprep.mubr.msk.f32.mxu0 %vm1355_vm2, %v5953_v43 }
 0x750   :  { %5074 = vmatmul.mubr.msk.f32.gmra.mrb[48].mxu0 %vm1355_vm2, %v5954_v44 }
 0x751   :  { %5076 = vmatprep.mubr.msk.f32.mxu0 %vm1355_vm2, %v5955_v45 }
 0x754   :  { %5077 = vmatmul.mubr.msk.f32.gmra.mrb[50].mxu0 %vm1355_vm2, %v5956_v46 }
 0x755   :  { %5079 = vmatprep.mubr.msk.f32.mxu0 %vm1355_vm2, %v5957_v47 }
 0x758   :  { %5080 = vmatmul.mubr.msk.f32.gmra.mrb[52].mxu0 %vm1355_vm2, %v5958_v48 }
 0x80f   :  { %v5060_v27 = vpop.f32.mrb[38].mxu0 }
 0x810   :  { %v3420_v14 = vpop.f32.mrb[39].mxu0  ;;  %v5285_v35 = vadd.f32 %v5060_v27, %v6576_v6 }
 0x811   :  { %v5286_v32 = vadd.f32 %v3420_v14, %v6578_v7 }
 0x812   :  { %v4382_v28 = vmul.f32 -1.442695, %v5285_v35 }
 0x813   :  { %v5063_v63 = vpop.f32.mrb[40].mxu0  ;;  %v4381_v31 = vmul.f32 -1.442695, %v5286_v32 }
 0x814   :  { %v3430_v56 = vpop.f32.mrb[41].mxu0  ;;  %5852 = vpow2.f32 %v4382_v28  ;;  %v5287_v58 = vadd.f32 %v5063_v63, %v6593_v26 }
 0x815   :  { %5854 = vpow2.f32 %v4381_v31  ;;  %v5288_v6 = vadd.f32 %v3430_v56, %v6597_v30 }
 0x816   :  { %v4384_v54 = vmul.f32 -1.442695, %v5287_v58 }
 0x817   :  { %v5066_v12 = vpop.f32.mrb[42].mxu0  ;;  %v4383_v13 = vmul.f32 -1.442695, %v5288_v6 }
 0x818   :  { %v5289_v62 = vadd.f32 %v5066_v12, %v6580_v8  ;;  %v3440_v4 = vpop.f32.mrb[43].mxu0 }
 0x819   :  { %v5290_v22 = vadd.f32 %v3440_v4, %v6582_v11 }
 0x81a   :  { %v4386_v53 = vmul.f32 -1.442695, %v5289_v62 }
 0x81b   :  { %v5069_v21 = vpop.f32.mrb[44].mxu0  ;;  %v4385_v59 = vmul.f32 -1.442695, %v5290_v22 }
 0x81c   :  { %v3450_v36 = vpop.f32.mrb[45].mxu0  ;;  %5856 = vpow2.f32 %v4386_v53  ;;  %v5291_v11 = vadd.f32 %v5069_v21, %v6584_v15 }
 0x81d   :  { %5858 = vpow2.f32 %v4385_v59  ;;  %v5292_v57 = vadd.f32 %v3450_v36, %v6587_v17 }
 0x81e   :  { %5860 = vpow2.f32 %v4384_v54  ;;  %v4388_v25 = vmul.f32 -1.442695, %v5291_v11  ;;  %v5853_v41 = vpop.eup %5852 }
 0x81f   :  { %v5072_v7 = vpop.f32.mrb[46].mxu0  ;;  %5862 = vpow2.f32 %v4383_v13  ;;  %v4387_v40 = vmul.f32 -1.442695, %v5292_v57  ;;  %v5855_v17 = vpop.eup %5854  ;;  %v3580_v47 = vadd.f32 1.0, %v5853_v41 }
 0x820   :  { %v5293_v8 = vadd.f32 %v5072_v7, %v6574_v5  ;;  %v3460_v0 = vpop.f32.mrb[47].mxu0 }
 0x821   :  { %v5294_v34 = vadd.f32 %v3460_v0, %v6570_v2 }
 0x822   :  { %v4378_v9 = vmul.f32 -2.0, %v5293_v8 }
 0x823   :  { %v4377_v20 = vmul.f32 -2.0, %v5294_v34  ;;  %v5075_v26 = vpop.f32.mrb[48].mxu0 }
 0x824   :  { %v3565_v29 = vmul.f32 1.442695, %v4378_v9  ;;  %v5295_v30 = vadd.f32 %v5075_v26, %v6572_v3  ;;  %v3470_v23 = vpop.f32.mrb[49].mxu0 }
 0x825   :  { %v3563_v24 = vmul.f32 1.442695, %v4377_v20  ;;  %v5296_v5 = vadd.f32 %v3470_v23, %v6568_v1  ;;  %v3579_v1 = vadd.f32 1.0, %v5855_v17 }
 0x826   :  { %v4380_v15 = vmul.f32 -2.0, %v5295_v30  ;;  %5864 = vpow2.f32 %v3565_v29  ;;  %v5857_v45 = vpop.eup %5856 }
 0x827   :  { %v4379_v2 = vmul.f32 -2.0, %v5296_v5  ;;  %v5078_v42 = vpop.f32.mrb[50].mxu0  ;;  %5866 = vpow2.f32 %v3563_v24  ;;  %v5859_v46 = vpop.eup %5858  ;;  %v3584_v19 = vadd.f32 1.0, %v5857_v45 }
 0x828   :  { %v3569_v43 = vmul.f32 1.442695, %v4380_v15  ;;  %v3480_v44 = vpop.f32.mrb[51].mxu0  ;;  %5868 = vpow2.f32 %v4388_v25  ;;  %v5297_v48 = vadd.f32 %v5078_v42, %v6605_v10  ;;  %v3583_v39 = vadd.f32 1.0, %v5859_v46  ;;  %v5861_v14 = vpop.eup %5860 }
 0x829   :  { %v3567_v3 = vmul.f32 1.442695, %v4379_v2  ;;  %5870 = vpow2.f32 %v4387_v40  ;;  %v5298_v49 = vadd.f32 %v3480_v44, %v6609_v18  ;;  %v5863_v35 = vpop.eup %5862  ;;  %v3582_v58 = vadd.f32 1.0, %v5861_v14 }
 0x82a   :  { %5872 = vpow2.f32 %v3569_v43  ;;  %v4390_v16 = vmul.f32 -1.442695, %v5297_v48  ;;  %v3581_v7 = vadd.f32 1.0, %v5863_v35 }
 0x82b   :  { %v5081_v50 = vpop.f32.mrb[52].mxu0  ;;  %5874 = vpow2.f32 %v3567_v3  ;;  %v4389_v63 = vmul.f32 -1.442695, %v5298_v49 }
 0x82c   :  { %v3490_v51 = vpop.f32.mrb[53].mxu0  ;;  %5876 = vrcp.f32 %v3580_v47  ;;  %v5299_v27 = vadd.f32 %v5081_v50, %v6617_v61 }
 0x82d   :  { %5878 = vrcp.f32 %v3579_v1  ;;  %v5300_v56 = vadd.f32 %v3490_v51, %v6619_v55 }
 0x82e   :  { %5880 = vrcp.f32 %v3584_v19  ;;  %v4392_v12 = vmul.f32 -1.442695, %v5299_v27 }
 0x82f   :  { %5882 = vrcp.f32 %v3583_v39  ;;  %v4391_v28 = vmul.f32 -1.442695, %v5300_v56 }
 0x830   :  { %v5865_v10 = vpop.eup %5864  ;;  %5884 = vpow2.f32 %v4390_v16 }
 0x831   :  { %v5867_v32 = vpop.eup %5866  ;;  %v3588_v18 = vadd.f32 1.0, %v5865_v10  ;;  %5886 = vpow2.f32 %v4389_v63 }
 0x832   :  { %v5869_v62 = vpop.eup %5868  ;;  %v3587_v4 = vadd.f32 1.0, %v5867_v32 }
 0x833   :  { %v5871_v22 = vpop.eup %5870  ;;  %5888 = vrcp.f32 %v3588_v18  ;;  %v3586_v53 = vadd.f32 1.0, %v5869_v62 }
 0x834   :  { %v5873_v61 = vpop.eup %5872  ;;  %5890 = vrcp.f32 %v3587_v4  ;;  %v3585_v55 = vadd.f32 1.0, %v5871_v22  ;;  %v3683_v22 = vld [vmem:[%s7179_s1] sm:$0x1f] }
 0x835   :  { %v5875_v31 = vpop.eup %5874  ;;  %v3590_v21 = vadd.f32 1.0, %v5873_v61  ;;  %5892 = vpow2.f32 %v4392_v12  ;;  %v3685_v61 = vld [vmem:[%s7183_s5 + $0x8] sm:$0xff] }
 0x836   :  { %v3589_v59 = vadd.f32 1.0, %v5875_v31  ;;  %5894 = vpow2.f32 %v4391_v28  ;;  %v5877_v36 = vpop.eup %5876  ;;  %v3686_v31 = vld [vmem:[%s7183_s5 + $0x10] sm:$0xff] }
 0x837   :  { %5896 = vrcp.f32 %v3590_v21  ;;  %v5879_v6 = vpop.eup %5878  ;;  %v3679_v21 = vld [vmem:[%s7182_s4] sm:$0xff] }
 0x838   :  { %5898 = vrcp.f32 %v3589_v59  ;;  %v5881_v8 = vpop.eup %5880  ;;  %v3681_v59 = vld [vmem:[%s7182_s4 + $0x10] sm:$0xff] }
 0x839   :  { %5900 = vrcp.f32 %v3586_v53  ;;  %v5883_v0 = vpop.eup %5882  ;;  %v3660_v40 = vmul.f32 %v5881_v8, %v7021_v52  ;;  %v3687_v53 = vld [vmem:[%s7183_s5 + $0x18] sm:$0xff]  ;;  %v3889_v8 = vpop.permute.xlu0 %3888 }
 0x83a   :  { %5902 = vrcp.f32 %v3585_v55  ;;  %v5885_v54 = vpop.eup %5884  ;;  %v3659_v42 = vmul.f32 %v5883_v0, %v7023_v33  ;;  %v3680_v55 = vld [vmem:[%s7182_s4 + $0x8] sm:$0xff]  ;;  %v3893_v0 = vpop.permute.xlu1 %3892 }
 0x83b   :  { %5904 = vrcp.f32 %v3582_v58  ;;  %v5887_v11 = vpop.eup %5886  ;;  %v3592_v30 = vadd.f32 1.0, %v5885_v54  ;;  %v5990_v58 = vmov 0.0|0.0  }
 0x83c   :  { %5906 = vrcp.f32 %v3581_v7  ;;  %v3591_v24 = vadd.f32 1.0, %v5887_v11  ;;  %v5992_v7 = vmov 2  }
 0x83d   :  { %v5889_v34 = vpop.eup %5888  ;;  %5908 = vrcp.f32 %v3592_v30  ;;  %5418 = vset.pattern.permute.xlu1 %v5992_v7  ;;  %5419 = vset.pattern.permute.xlu0 %v5992_v7 }
 0x83e   :  { %v5891_v13 = vpop.eup %5890  ;;  %v3636_v57 = vmul.f32 2.0, %v5889_v34  ;;  %5910 = vrcp.f32 %v3591_v24 }
 0x83f   :  { %v5893_v9 = vpop.eup %5892  ;;  %v3635_v20 = vmul.f32 2.0, %v5891_v13 }
 0x840   :  { %v5895_v26 = vpop.eup %5894  ;;  %v4394_v29 = vadd.f32 -1.0, %v3636_v57  ;;  %v3594_v46 = vadd.f32 1.0, %v5893_v9 }
 0x841   :  { %v5897_v23 = vpop.eup %5896  ;;  %v4393_v25 = vadd.f32 -1.0, %v3635_v20  ;;  %v3593_v49 = vadd.f32 1.0, %v5895_v26 }
 0x842   :  { %v5899_v5 = vpop.eup %5898  ;;  %v3664_v15 = vmul.f32 %v5877_v36, %v4394_v29  ;;  %v3638_v41 = vmul.f32 2.0, %v5897_v23  ;;  %v3682_v36 = vld [vmem:[%s7182_s4 + $0x18] sm:$0xff]  ;;  %v3897_v29 = vpop.permute.xlu1 %3896 }
 0x843   :  { %v5901_v2 = vpop.eup %5900  ;;  %v3663_v17 = vmul.f32 %v5879_v6, %v4393_v25  ;;  %v3637_v43 = vmul.f32 2.0, %v5899_v5  ;;  %v78_v6 = vld [vmem:[%s7185_s7] sm:$0x1] }
 0x844   :  { %v5903_v44 = vpop.eup %5902  ;;  %v3668_v45 = vadd.f32 %v3664_v15, %v3660_v40  ;;  %v4396_v3 = vadd.f32 -1.0, %v3638_v41  ;;  %v3662_v52 = vmul.f32 %v5901_v2, %v7029_v60  ;;  %3922 = vperm.xlu1 %5418, %v78_v6  }
 0x845   :  { %v5905_v47 = vpop.eup %5904  ;;  %v3667_v48 = vadd.f32 %v3663_v17, %v3659_v42  ;;  %v4395_v1 = vadd.f32 -1.0, %v3637_v43  ;;  %v3661_v33 = vmul.f32 %v5903_v44, %v7031_v37  ;;  %v3919_v17 = vld [vmem:[%s7184_s6] sm:$0x1]  ;;  %s5967_s6 = scalar_lea.vmem %s4013_s17, 32 }
 0x846   :  { %v5907_v50 = vpop.eup %5906  ;;  %5912 = vtanh.f32 %v3668_v45  ;;  %v3666_v19 = vmul.f32 %v5905_v47, %v4396_v3  ;;  %p5969_p2 = scmp.lt.s32.totalorder %s5967_s6, %s5963_s18 }
 0x847   :  { %5914 = vtanh.f32 %v3667_v48  ;;  %v3665_v51 = vmul.f32 %v5907_v50, %v4395_v1  ;;  %v5909_v27 = vpop.eup %5908 }
 0x848   :  { %v3670_v39 = vadd.f32 %v3666_v19, %v3662_v52  ;;  %5916 = vrcp.f32 %v3594_v46  ;;  %v5911_v14 = vpop.eup %5910  ;;  %p5970_p3 = por %p5969_p2, %p5968_p1 }
 0x849   :  { %v3669_v16 = vadd.f32 %v3665_v51, %v3661_v33  ;;  %5918 = vrcp.f32 %v3593_v49 }
 0x84a   :  { %5920 = vtanh.f32 %v3670_v39  ;;  %p5971_p4 = pnand %p5970_p3, %p5964_p0 }
 0x84b   :  { %5922 = vtanh.f32 %v3669_v16 }
 0x850   :  { %v5913_v63 = vpop.eup %5912 }
 0x851   :  { %v5915_v56 = vpop.eup %5914  ;;  %v3676_v35 = vmul.f32 %v5913_v63, %v5909_v27 }
 0x852   :  { %v5917_v10 = vpop.eup %5916  ;;  %v3675_v32 = vmul.f32 %v5915_v56, %v5911_v14 }
 0x853   :  { %v5919_v18 = vpop.eup %5918 }
 0x854   :  { %v5921_v60 = vpop.eup %5920  ;;  %v5163_v12 = vpack.c.bf16 %v3676_v35, %v3675_v32 }
 0x855   :  { %v5923_v62 = vpop.eup %5922  ;;  %v3678_v4 = vmul.f32 %v5921_v60, %v5917_v10 }
 0x856   :  { %5164 = vmatprep.subr.bf16.mxu1 %v5163_v12  ;;  %v3677_v37 = vmul.f32 %v5923_v62, %v5919_v18 }
 0x857   :  { %5166 = vmatpush3.bf16.msra.mxu1 %v5163_v12 }
 0x858   :  { %v5167_v28 = vpack.c.bf16 %v3678_v4, %v3677_v37 }
 0x85a   :  { %5168 = vmatprep.subr.bf16.mxu1 %v5167_v28 }
 0x85b   :  { %5170 = vmatpush3.bf16.msra.mxu1 %v5167_v28 }
 0x85c   :  { %5096 = vmatprep.subr.msk.mxu1 %vm3798_vm3, %v3683_v22 }
 0x85e   :  { %5091 = vmatmul.mubr.msk.f32.vlgmr.msra.gmra.mrb[58].mxu1 %vm1355_vm2, %v3685_v61 }
 0x85f   :  { %5093 = vmatprep.mubr.msk.f32.mxu1 %vm1355_vm2, %v3686_v31  ;;  %5097 = vmatpush3.msk.msra.mxu1 %vm3798_vm3, %v3683_v22 }
 0x860   :  { %5171 = vmatprep.subr.bf16.mxu1 %v5990_v58 }
 0x862   :  { %5094 = vmatmul.mubr.msk.f32.gmra.mrb[60].mxu1 %vm1355_vm2, %v3687_v53 }
 0x863   :  { %5098 = vmatprep.mubr.msk.f32.mxu1 %vm3785_vm4, %v3679_v21 }
 0x866   :  { %5099 = vmatmul.mubr.msk.f32.vlgmr.msra.gmra.mrb[58].mxu1 %vm3785_vm4, %v3680_v55 }
 0x867   :  { %5101 = vmatprep.mubr.msk.f32.mxu1 %vm3785_vm4, %v3681_v59 }
 0x86a   :  { %5102 = vmatmul.mubr.msk.f32.gmra.mrb[60].mxu1 %vm3785_vm4, %v3682_v36 }
 0x86b   :  { %5112 = vmatprep.mubr.msk.f32.mxu1 %vm5991_vm5, %v5988_v38  ;;  %v3901_v38 = vpop.permute.xlu0 %3900 }
 0x8c3   :  { %v3923_v43 = vpop.permute.xlu1 %3922 }
 0x939   :  { %v5100_v54 = vpop.f32.mrb[58].mxu1 }
 0x93a   :  { %v3904_v11 = vadd.f32 %v5100_v54, %v3893_v0  ;;  %v3868_v34 = vpop.f32.mrb[59].mxu1 }
 0x93b   :  { %v3903_v13 = vadd.f32 %v3889_v8, %v3868_v34 }
 0x93c   :  { %vm3908_vm6 = vcmp.ge.f32.partialorder %v3904_v11, 0.0  ;;  %v3912_v57 = vmul.f32 0.01, %v3904_v11 }
 0x93d   :  { %vm3907_vm7 = vcmp.ge.f32.partialorder %v3903_v13, 0.0  ;;  %v3911_v9 = vmul.f32 0.01, %v3903_v13  ;;  %v5103_v20 = vpop.f32.mrb[60].mxu1 }
 0x93e   :  { %v3916_v26 = vsel %vm3908_vm6, %v3904_v11, %v3912_v57  ;;  %v3906_v30 = vadd.f32 %v5103_v20, %v3901_v38  ;;  %v3878_v23 = vpop.f32.mrb[61].mxu1 }
 0x93f   :  { %v3915_v25 = vsel %vm3907_vm7, %v3903_v13, %v3911_v9  ;;  %v3905_v24 = vadd.f32 %v3897_v29, %v3878_v23 }
 0x940   :  { %v5172_v5 = vpack.c.bf16 %v3916_v26, %v3915_v25  ;;  %vm3910_vm8 = vcmp.ge.f32.partialorder %v3906_v30, 0.0  ;;  %v3914_v40 = vmul.f32 0.01, %v3906_v30 }
 0x941   :  { %vm3909_vm9 = vcmp.ge.f32.partialorder %v3905_v24, 0.0  ;;  %v3913_v15 = vmul.f32 0.01, %v3905_v24 }
 0x942   :  { %v3918_v41 = vsel %vm3910_vm8, %v3906_v30, %v3914_v40  ;;  %5173 = vmatpush3.bf16.msra.mxu1 %v5172_v5 }
 0x943   :  { %v3917_v2 = vsel %vm3909_vm9, %v3905_v24, %v3913_v15  ;;  %5174 = vmatprep.subr.bf16.mxu1 %v5990_v58 }
 0x944   :  { %v5175_v42 = vpack.c.bf16 %v3918_v41, %v3917_v2 }
 0x946   :  { %5176 = vmatpush3.bf16.msra.mxu1 %v5175_v42 }
 0x949   :  { %5113 = vmatmul.mubr.msk.f32.vlgmr.msra.gmra.mrb[62].mxu1 %vm1355_vm2, %v3919_v17 }
 0xa1c   :  { %v3994_v44 = vpop.f32.mrb[62].mxu1 }
 0xa1d   :  { %v3995_v45 = vadd.f32 %v3994_v44, %v3923_v43  ;;  %v5114_v3 = vpop.f32.mrb[63].mxu1 }
 0xa1f   :  { %v4407_v46 = vmul.f32 -1.442695, %v3995_v45 }
 0xa21   :  { %5924 = vpow2.f32 %v4407_v46 }
 0xa2b   :  { %v5925_v47 = vpop.eup %5924 }
 0xa2c   :  { %v4001_v48 = vadd.f32 1.0, %v5925_v47 }
 0xa2e   :  { %5926 = vrcp.f32 %v4001_v48 }
 0xa38   :  { %v5927_v1 = vpop.eup %5926 }
 0xa39   :  { %4005 = vst.msk [vmem:[#allocation2] sm:$0x1] %vm4004_vm10, %v5927_v1 }
 0xa3a   :  { %5974 = shalt.err (!%p5971_p4)
}
 0xa3b   :  { %s5975_s3 = scalar_lea.hbm %s7186_s8, 16 }
 0xa3c   :  { %p5976_p5 = scmp.ne.s32.totalorder %s7186_s8, %s5975_s3  ;;  %p5979_p6 = scmp.lt.u32.totalorder %s5975_s3, %s7186_s8 }
 0xa3e   :  { %p5981_p7 = pnand %p5979_p6, %p5976_p5 }
 0xa40   :  { %5984 = shalt.err (!%p5981_p7)
}
 0xa41   :  { %4015 = dma.vmem_to_hbm [thread:$0]  %s4013_s17, 16, %s7186_s8, [#allocation3]  }
 0xa42   :  { %5985 = dma.done.wait [#allocation3], 16  }
 0xa43   :  { %5986 = vsyncadd [#allocation3], 4294967280 }
 0xa44   :  { %4019 = vsyncpa [#allocation3], 1 }

</bundles_post_ra>
